<compile_context>
chip_gen: v5e
topology: v5e:2x2
jax: 0.10.0
libtpu: 0.0.40
codegen_flags: <defaults>
</compile_context>

<pallas_src>
import functools
import math
from dataclasses import dataclass

import jax
import jax.numpy as jnp
from jax.experimental import pallas as pl
from jax.experimental.pallas import tpu as pltpu


@dataclass
class BackgroundOscillationArgs:
    osc_amplitude: float
    osc_freq: float
    osc_phase: float


@dataclass
class InputBackgroundOscillationArgs(BackgroundOscillationArgs):
    osc_offset: float


def _shr(h, k):
    """Logical right shift of int32 by a static amount (arith shift + mask)."""
    return (h >> k) & jnp.int32((1 << (32 - k)) - 1)


def _fmix32(h):
    """murmur3 32-bit finalizer (wrap-around int32 multiplies)."""
    h = h ^ _shr(h, 16)
    h = h * jnp.int32(-2048144789)   # 0x85ebca6b
    h = h ^ _shr(h, 13)
    h = h * jnp.int32(-1028477387)   # 0xc2b2ae35
    h = h ^ _shr(h, 16)
    return h


def _spike_encode_kernel(seed_ref, packed_ref, t_ref, col_ref, out_ref, *,
                         batch_block, flat_block, n_words, seq_len, t_total,
                         thr_active, thr_inactive,
                         osc_active, osc_amp, osc_offset, freq_dt, base_phase):
    blk_b = pl.program_id(0)
    blk_f = pl.program_id(1)

    t_i = t_ref[...]          # (1, Fb)  int32: time step of each flat position
    col = col_ref[...]        # (1, Fb)  int32: column index 2*i + n
    pk = packed_ref[...]      # (Bb, W)  int32: packed binary inputs

    # Global flat position (batch independent) and batch row index.
    pos = blk_f * flat_block + jax.lax.broadcasted_iota(
        jnp.int32, (1, flat_block), 1)                       # (1, Fb)
    b_idx = blk_b * batch_block + jax.lax.broadcasted_iota(
        jnp.int32, (batch_block, 1), 0)                      # (Bb, 1)

    # --- counter-based PRNG: one 24-bit uniform per output element ----------
    key0 = _fmix32(seed_ref[0] ^ jnp.int32(1540483477))          # per call
    key_b = _fmix32(key0 ^ (b_idx * jnp.int32(-1640531527)))     # per batch row
    h = _fmix32(pos ^ key_b)
    h = _fmix32(h + key_b)                                        # (Bb, Fb)
    u = _shr(h, 8).astype(jnp.float32) * jnp.float32(1.0 / (1 << 24))

    # --- decode interleaved (x, 1-x) activity from packed bits --------------
    g = col >> 1              # population-group (input feature) index
    n_par = col & 1           # 0 -> x neuron, 1 -> (1 - x) neuron
    w_idx = g >> 4
    bitpos = g & 15
    word = jnp.where(w_idx == 0, pk[:, 0:1], jnp.int32(0))        # (Bb, Fb)
    for w in range(1, n_words):
        word = jnp.where(w_idx == w, pk[:, w:w + 1], word)
    active = ((word >> bitpos) & 1) ^ n_par                       # {0, 1}

    # --- Bernoulli threshold (dt folded into the rate constants) ------------
    thr = thr_inactive + (thr_active - thr_inactive) * active.astype(jnp.float32)
    if osc_active:
        # phase = 2*pi*freq*dt*(t + b*(T+D)) + base, range-reduced to one cycle
        cyc = freq_dt * (t_i.astype(jnp.float32)
                         + b_idx.astype(jnp.float32) * float(t_total))
        cyc = cyc - jnp.floor(cyc)
        phase = (2.0 * math.pi) * cyc + base_phase
        rate_mod = osc_amp * (1.0 + jnp.sin(phase)) + osc_offset
        thr = thr * rate_mod

    # Delay-gap mask (t >= seq_len) folded directly into the compare.
    spikes = jnp.logical_and(u < thr, t_i < seq_len)
    out_ref[...] = spikes.astype(out_ref.dtype)


class SpikePopulationGroupBatchToTimeEncoder:
    def __init__(self, presentation_duration=0.1, active_rate=100.0,
                 inactive_rate=0.0, delay=0.01, dt=0.001,
                 background_oscillation_args: InputBackgroundOscillationArgs = None,
                 out_dtype=jnp.float32):
        self.dt = float(dt)
        self.seq_length = int(presentation_duration / dt)
        self.delay_shift = int(delay / dt)
        self.active_rate = float(active_rate)
        self.inactive_rate = float(inactive_rate)
        self.osc = background_oscillation_args
        # Spikes are exactly {0, 1}; pass jnp.bfloat16 here to halve HBM
        # writeback if downstream tolerates it.
        self.out_dtype = out_dtype

    def get_shift_between_patterns(self):
        return self.seq_length + self.delay_shift

    def __call__(self, input_values, seed, start_phase=None):
        x = jnp.asarray(input_values, dtype=jnp.float32)
        B, I = x.shape
        ncol = 2 * I
        t_total = self.seq_length + self.delay_shift
        n_flat = t_total * ncol

        # Pack binary activity bits: 16 bits per int32 word (in-kernel interleave).
        n_words = (I + 15) // 16
        xb = (x > 0.5).astype(jnp.int32)
        bitpos = jnp.arange(I, dtype=jnp.int32)
        contrib = xb << (bitpos % 16)[None, :]
        word_of = bitpos // 16
        packed = jnp.stack(
            [jnp.sum(jnp.where(word_of == w, contrib, 0), axis=1)
             for w in range(n_words)], axis=1).astype(jnp.int32)   # (B, n_words)

        # Per-flat-position (t, col) lookup tables (batch independent, tiny);
        # avoids per-element integer div/mod inside the kernel.
        flat = jnp.arange(n_flat, dtype=jnp.int32)
        t_idx = (flat // ncol).reshape(1, n_flat)
        col_idx = (flat % ncol).reshape(1, n_flat)

        osc_active = self.osc is not None
        if osc_active:
            base_phase = (float(self.osc.osc_phase)
                          if start_phase is None else float(start_phase))
            base_phase_red = math.fmod(base_phase, 2.0 * math.pi)
            osc_amp = float(self.osc.osc_amplitude)
            osc_freq = float(self.osc.osc_freq)
            osc_off = float(self.osc.osc_offset)
            freq_dt = osc_freq * self.dt
        else:
            base_phase_red = osc_amp = osc_freq = osc_off = freq_dt = 0.0

        # Block sizes: block the batch axis (amortize ~0.35us/grid-step) and
        # tile the flat axis only when blocks would otherwise get large.
        batch_block = B if B <= 8 else 8
        max_block_elems = 128 * 1024
        if batch_block * n_flat <= max_block_elems:
            flat_block = n_flat
        else:
            flat_block = max(128, (max_block_elems // batch_block) // 128 * 128)
        grid = (pl.cdiv(B, batch_block), pl.cdiv(n_flat, flat_block))

        kernel = functools.partial(
            _spike_encode_kernel,
            batch_block=batch_block, flat_block=flat_block, n_words=n_words,
            seq_len=self.seq_length, t_total=t_total,
            thr_active=self.dt * self.active_rate,
            thr_inactive=self.dt * self.inactive_rate,
            osc_active=osc_active, osc_amp=osc_amp, osc_offset=osc_off,
            freq_dt=freq_dt, base_phase=base_phase_red)

        out = pl.pallas_call(
            kernel,
            out_shape=jax.ShapeDtypeStruct((B, n_flat), self.out_dtype),
            grid_spec=pltpu.PrefetchScalarGridSpec(
                num_scalar_prefetch=1,
                grid=grid,
                in_specs=[
                    pl.BlockSpec((batch_block, n_words),
                                 lambda b, f, seed: (b, 0)),
                    pl.BlockSpec((1, flat_block), lambda b, f, seed: (0, f)),
                    pl.BlockSpec((1, flat_block), lambda b, f, seed: (0, f)),
                ],
                out_specs=pl.BlockSpec((batch_block, flat_block),
                                       lambda b, f, seed: (b, f)),
            ),
            compiler_params=pltpu.CompilerParams(
                dimension_semantics=("parallel", "parallel")),
        )(jnp.full((1,), seed, dtype=jnp.int32), packed, t_idx, col_idx)

        # Free contiguous reshape == rearrange('t b i n -> (b t) (i n)').
        combined = out.reshape(B * t_total, ncol)

        if osc_active:
            # Equivalent to the torch value modulo 2*pi (sin is periodic);
            # reduced to avoid f32 phase blow-up when chained across calls.
            inc = math.fmod(2.0 * math.pi * t_total * B * self.dt * osc_freq,
                            2.0 * math.pi)
            next_start_phase = inc + base_phase_red
        else:
            next_start_phase = None
        return combined, next_start_phase


if __name__ == "__main__":
    key = jax.random.PRNGKey(0)
    B, I = 2, 4

    osc_args = InputBackgroundOscillationArgs(
        osc_amplitude=0.5, osc_freq=40.0, osc_phase=0.0, osc_offset=0.25)
    enc = SpikePopulationGroupBatchToTimeEncoder(
        presentation_duration=0.1, active_rate=100.0, inactive_rate=0.0,
        delay=0.01, dt=0.001, background_oscillation_args=osc_args)

    x = jax.random.bernoulli(key, 0.5, (B, I)).astype(jnp.float32)

    combined, next_start_phase = enc(x, seed=42)
    combined = jax.block_until_ready(combined)

    t_total = enc.seq_length + enc.delay_shift            # 100 + 10 = 110
    ncol = 2 * I
    assert combined.shape == (B * t_total, ncol)
    assert combined.dtype == jnp.float32
    # Outputs are binary spikes.
    assert bool(jnp.all((combined == 0.0) | (combined == 1.0)))
    # Delay gaps between patterns are silent.
    gaps = combined.reshape(B, t_total, ncol)[:, enc.seq_length:, :]
    assert bool(jnp.all(gaps == 0.0))
    # With inactive_rate = 0, the complementary ("inactive") neuron of each
    # pair is silent, and the active ones do spike.
    r = combined.reshape(B, t_total, I, 2)
    inactive_chan = jnp.where(x[:, None, :, None] > 0.5,
                              r[..., 1:2], r[..., 0:1])
    assert bool(jnp.all(inactive_chan == 0.0))
    assert float(combined.sum()) > 0.0
    assert next_start_phase is not None

    # Different seed -> different (but still valid) spike train.
    combined2, _ = enc(x, seed=7)
    combined2 = jax.block_until_ready(combined2)
    assert not bool(jnp.all(combined2 == combined))

    # No-oscillation path.
    enc_plain = SpikePopulationGroupBatchToTimeEncoder(
        presentation_duration=0.1, active_rate=100.0, inactive_rate=0.0,
        delay=0.01, dt=0.001, background_oscillation_args=None)
    c3, nsp3 = enc_plain(x, seed=3)
    c3 = jax.block_until_ready(c3)
    assert c3.shape == (B * t_total, ncol)
    assert nsp3 is None

    print("KERNEL_OK")
</pallas_src>

<mosaic_0001>
module attributes {stable_mosaic.version = 11 : i64} {
  func.func @_spike_encode_kernel(%arg0: i32, %arg1: i32, %arg2: memref<1xi32, #tpu.memory_space<smem>>, %arg3: memref<2x1xi32, #tpu.memory_space<vmem>>, %arg4: memref<1x880xi32, #tpu.memory_space<vmem>>, %arg5: memref<1x880xi32, #tpu.memory_space<vmem>>, %arg6: memref<2x880xf32, #tpu.memory_space<vmem>>) attributes {dimension_semantics = [#tpu.dimension_semantics<parallel>, #tpu.dimension_semantics<parallel>], iteration_bounds = array<i64: 1, 1>, scalar_prefetch = 1 : i64, scratch_operands = 0 : i64, tpu.core_type = #tpu.core_type<tc>, window_params = [{transform_indices = @transform_0, window_bounds = array<i64: 2, 1>}, {transform_indices = @transform_1, window_bounds = array<i64: 1, 880>}, {transform_indices = @transform_2, window_bounds = array<i64: 1, 880>}, {transform_indices = @transform_3, window_bounds = array<i64: 2, 880>}]} {
    %c0 = arith.constant 0 : index
    %c0_0 = arith.constant 0 : index
    %0 = vector.load %arg4[%c0, %c0_0] : memref<1x880xi32, #tpu.memory_space<vmem>>, vector<1x880xi32>
    %c0_1 = arith.constant 0 : index
    %c0_2 = arith.constant 0 : index
    %1 = vector.load %arg5[%c0_1, %c0_2] : memref<1x880xi32, #tpu.memory_space<vmem>>, vector<1x880xi32>
    %c0_3 = arith.constant 0 : index
    %c0_4 = arith.constant 0 : index
    %2 = vector.load %arg3[%c0_3, %c0_4] : memref<2x1xi32, #tpu.memory_space<vmem>>, vector<2x1xi32>
    %c880_i32 = arith.constant 880 : i32
    %3 = arith.muli %arg1, %c880_i32 : i32
    %4 = tpu.iota {dimensions = array<i32: 1>} : vector<1x880xi32>
    %5 = vector.broadcast %3 : i32 to vector<1x880xi32>
    %6 = arith.addi %5, %4 : vector<1x880xi32>
    %c2_i32 = arith.constant 2 : i32
    %7 = arith.muli %arg0, %c2_i32 : i32
    %8 = tpu.iota {dimensions = array<i32: 0>} : vector<2x1xi32>
    %9 = vector.broadcast %7 : i32 to vector<2x1xi32>
    %10 = arith.addi %9, %8 : vector<2x1xi32>
    %c0_5 = arith.constant 0 : index
    %11 = memref.load %arg2[%c0_5] : memref<1xi32, #tpu.memory_space<smem>>
    %c1540483477_i32 = arith.constant 1540483477 : i32
    %12 = arith.xori %11, %c1540483477_i32 : i32
    %c16_i32 = arith.constant 16 : i32
    %13 = arith.shrsi %12, %c16_i32 : i32
    %c65535_i32 = arith.constant 65535 : i32
    %14 = arith.andi %13, %c65535_i32 : i32
    %15 = arith.xori %12, %14 : i32
    %c-2048144789_i32 = arith.constant -2048144789 : i32
    %16 = arith.muli %15, %c-2048144789_i32 : i32
    %c13_i32 = arith.constant 13 : i32
    %17 = arith.shrsi %16, %c13_i32 : i32
    %c524287_i32 = arith.constant 524287 : i32
    %18 = arith.andi %17, %c524287_i32 : i32
    %19 = arith.xori %16, %18 : i32
    %c-1028477387_i32 = arith.constant -1028477387 : i32
    %20 = arith.muli %19, %c-1028477387_i32 : i32
    %c16_i32_6 = arith.constant 16 : i32
    %21 = arith.shrsi %20, %c16_i32_6 : i32
    %c65535_i32_7 = arith.constant 65535 : i32
    %22 = arith.andi %21, %c65535_i32_7 : i32
    %23 = arith.xori %20, %22 : i32
    %c-1640531527_i32 = arith.constant -1640531527 : i32
    %24 = vector.broadcast %c-1640531527_i32 : i32 to vector<2x1xi32>
    %25 = arith.muli %10, %24 : vector<2x1xi32>
    %26 = vector.broadcast %23 : i32 to vector<2x1xi32>
    %27 = arith.xori %26, %25 : vector<2x1xi32>
    %c16_i32_8 = arith.constant 16 : i32
    %28 = vector.broadcast %c16_i32_8 : i32 to vector<2x1xi32>
    %29 = arith.shrsi %27, %28 : vector<2x1xi32>
    %c65535_i32_9 = arith.constant 65535 : i32
    %30 = vector.broadcast %c65535_i32_9 : i32 to vector<2x1xi32>
    %31 = arith.andi %29, %30 : vector<2x1xi32>
    %32 = arith.xori %27, %31 : vector<2x1xi32>
    %c-2048144789_i32_10 = arith.constant -2048144789 : i32
    %33 = vector.broadcast %c-2048144789_i32_10 : i32 to vector<2x1xi32>
    %34 = arith.muli %32, %33 : vector<2x1xi32>
    %c13_i32_11 = arith.constant 13 : i32
    %35 = vector.broadcast %c13_i32_11 : i32 to vector<2x1xi32>
    %36 = arith.shrsi %34, %35 : vector<2x1xi32>
    %c524287_i32_12 = arith.constant 524287 : i32
    %37 = vector.broadcast %c524287_i32_12 : i32 to vector<2x1xi32>
    %38 = arith.andi %36, %37 : vector<2x1xi32>
    %39 = arith.xori %34, %38 : vector<2x1xi32>
    %c-1028477387_i32_13 = arith.constant -1028477387 : i32
    %40 = vector.broadcast %c-1028477387_i32_13 : i32 to vector<2x1xi32>
    %41 = arith.muli %39, %40 : vector<2x1xi32>
    %c16_i32_14 = arith.constant 16 : i32
    %42 = vector.broadcast %c16_i32_14 : i32 to vector<2x1xi32>
    %43 = arith.shrsi %41, %42 : vector<2x1xi32>
    %c65535_i32_15 = arith.constant 65535 : i32
    %44 = vector.broadcast %c65535_i32_15 : i32 to vector<2x1xi32>
    %45 = arith.andi %43, %44 : vector<2x1xi32>
    %46 = arith.xori %41, %45 : vector<2x1xi32>
    %47 = vector.broadcast %6 : vector<1x880xi32> to vector<2x880xi32>
    %48 = vector.broadcast %46 : vector<2x1xi32> to vector<2x880xi32>
    %49 = arith.xori %47, %48 : vector<2x880xi32>
    %c16_i32_16 = arith.constant 16 : i32
    %50 = vector.broadcast %c16_i32_16 : i32 to vector<2x880xi32>
    %51 = arith.shrsi %49, %50 : vector<2x880xi32>
    %c65535_i32_17 = arith.constant 65535 : i32
    %52 = vector.broadcast %c65535_i32_17 : i32 to vector<2x880xi32>
    %53 = arith.andi %51, %52 : vector<2x880xi32>
    %54 = arith.xori %49, %53 : vector<2x880xi32>
    %c-2048144789_i32_18 = arith.constant -2048144789 : i32
    %55 = vector.broadcast %c-2048144789_i32_18 : i32 to vector<2x880xi32>
    %56 = arith.muli %54, %55 : vector<2x880xi32>
    %c13_i32_19 = arith.constant 13 : i32
    %57 = vector.broadcast %c13_i32_19 : i32 to vector<2x880xi32>
    %58 = arith.shrsi %56, %57 : vector<2x880xi32>
    %c524287_i32_20 = arith.constant 524287 : i32
    %59 = vector.broadcast %c524287_i32_20 : i32 to vector<2x880xi32>
    %60 = arith.andi %58, %59 : vector<2x880xi32>
    %61 = arith.xori %56, %60 : vector<2x880xi32>
    %c-1028477387_i32_21 = arith.constant -1028477387 : i32
    %62 = vector.broadcast %c-1028477387_i32_21 : i32 to vector<2x880xi32>
    %63 = arith.muli %61, %62 : vector<2x880xi32>
    %c16_i32_22 = arith.constant 16 : i32
    %64 = vector.broadcast %c16_i32_22 : i32 to vector<2x880xi32>
    %65 = arith.shrsi %63, %64 : vector<2x880xi32>
    %c65535_i32_23 = arith.constant 65535 : i32
    %66 = vector.broadcast %c65535_i32_23 : i32 to vector<2x880xi32>
    %67 = arith.andi %65, %66 : vector<2x880xi32>
    %68 = arith.xori %63, %67 : vector<2x880xi32>
    %69 = vector.broadcast %46 : vector<2x1xi32> to vector<2x880xi32>
    %70 = arith.addi %68, %69 : vector<2x880xi32>
    %c16_i32_24 = arith.constant 16 : i32
    %71 = vector.broadcast %c16_i32_24 : i32 to vector<2x880xi32>
    %72 = arith.shrsi %70, %71 : vector<2x880xi32>
    %c65535_i32_25 = arith.constant 65535 : i32
    %73 = vector.broadcast %c65535_i32_25 : i32 to vector<2x880xi32>
    %74 = arith.andi %72, %73 : vector<2x880xi32>
    %75 = arith.xori %70, %74 : vector<2x880xi32>
    %c-2048144789_i32_26 = arith.constant -2048144789 : i32
    %76 = vector.broadcast %c-2048144789_i32_26 : i32 to vector<2x880xi32>
    %77 = arith.muli %75, %76 : vector<2x880xi32>
    %c13_i32_27 = arith.constant 13 : i32
    %78 = vector.broadcast %c13_i32_27 : i32 to vector<2x880xi32>
    %79 = arith.shrsi %77, %78 : vector<2x880xi32>
    %c524287_i32_28 = arith.constant 524287 : i32
    %80 = vector.broadcast %c524287_i32_28 : i32 to vector<2x880xi32>
    %81 = arith.andi %79, %80 : vector<2x880xi32>
    %82 = arith.xori %77, %81 : vector<2x880xi32>
    %c-1028477387_i32_29 = arith.constant -1028477387 : i32
    %83 = vector.broadcast %c-1028477387_i32_29 : i32 to vector<2x880xi32>
    %84 = arith.muli %82, %83 : vector<2x880xi32>
    %c16_i32_30 = arith.constant 16 : i32
    %85 = vector.broadcast %c16_i32_30 : i32 to vector<2x880xi32>
    %86 = arith.shrsi %84, %85 : vector<2x880xi32>
    %c65535_i32_31 = arith.constant 65535 : i32
    %87 = vector.broadcast %c65535_i32_31 : i32 to vector<2x880xi32>
    %88 = arith.andi %86, %87 : vector<2x880xi32>
    %89 = arith.xori %84, %88 : vector<2x880xi32>
    %c8_i32 = arith.constant 8 : i32
    %90 = vector.broadcast %c8_i32 : i32 to vector<2x880xi32>
    %91 = arith.shrsi %89, %90 : vector<2x880xi32>
    %c16777215_i32 = arith.constant 16777215 : i32
    %92 = vector.broadcast %c16777215_i32 : i32 to vector<2x880xi32>
    %93 = arith.andi %91, %92 : vector<2x880xi32>
    %94 = arith.sitofp %93 : vector<2x880xi32> to vector<2x880xf32>
    %cst = arith.constant 5.96046448E-8 : f32
    %95 = vector.broadcast %cst : f32 to vector<2x880xf32>
    %96 = arith.mulf %94, %95 : vector<2x880xf32>
    %c1_i32 = arith.constant 1 : i32
    %97 = vector.broadcast %c1_i32 : i32 to vector<1x880xi32>
    %98 = arith.shrsi %1, %97 : vector<1x880xi32>
    %c1_i32_32 = arith.constant 1 : i32
    %99 = vector.broadcast %c1_i32_32 : i32 to vector<1x880xi32>
    %100 = arith.andi %1, %99 : vector<1x880xi32>
    %c4_i32 = arith.constant 4 : i32
    %101 = vector.broadcast %c4_i32 : i32 to vector<1x880xi32>
    %102 = arith.shrsi %98, %101 : vector<1x880xi32>
    %c15_i32 = arith.constant 15 : i32
    %103 = vector.broadcast %c15_i32 : i32 to vector<1x880xi32>
    %104 = arith.andi %98, %103 : vector<1x880xi32>
    %c0_i32 = arith.constant 0 : i32
    %105 = vector.broadcast %c0_i32 : i32 to vector<1x880xi32>
    %106 = arith.cmpi eq, %102, %105 : vector<1x880xi32>
    %c0_i32_33 = arith.constant 0 : i32
    %107 = vector.shape_cast %106 : vector<1x880xi1> to vector<1x880xi1>
    %108 = vector.broadcast %107 : vector<1x880xi1> to vector<2x880xi1>
    %109 = vector.shape_cast %2 : vector<2x1xi32> to vector<2x1xi32>
    %110 = vector.broadcast %109 : vector<2x1xi32> to vector<2x880xi32>
    %111 = vector.broadcast %c0_i32_33 : i32 to vector<2x880xi32>
    %112 = arith.select %108, %110, %111 : vector<2x880xi1>, vector<2x880xi32>
    %113 = vector.broadcast %104 : vector<1x880xi32> to vector<2x880xi32>
    %114 = arith.shrsi %112, %113 : vector<2x880xi32>
    %c1_i32_34 = arith.constant 1 : i32
    %115 = vector.broadcast %c1_i32_34 : i32 to vector<2x880xi32>
    %116 = arith.andi %114, %115 : vector<2x880xi32>
    %117 = vector.broadcast %100 : vector<1x880xi32> to vector<2x880xi32>
    %118 = arith.xori %116, %117 : vector<2x880xi32>
    %119 = arith.sitofp %118 : vector<2x880xi32> to vector<2x880xf32>
    %cst_35 = arith.constant 1.000000e-01 : f32
    %120 = vector.broadcast %cst_35 : f32 to vector<2x880xf32>
    %121 = arith.mulf %120, %119 : vector<2x880xf32>
    %cst_36 = arith.constant 0.000000e+00 : f32
    %122 = vector.broadcast %cst_36 : f32 to vector<2x880xf32>
    %123 = arith.addf %122, %121 : vector<2x880xf32>
    %124 = arith.sitofp %0 : vector<1x880xi32> to vector<1x880xf32>
    %125 = arith.sitofp %10 : vector<2x1xi32> to vector<2x1xf32>
    %cst_37 = arith.constant 1.100000e+02 : f32
    %126 = vector.broadcast %cst_37 : f32 to vector<2x1xf32>
    %127 = arith.mulf %125, %126 : vector<2x1xf32>
    %128 = vector.broadcast %124 : vector<1x880xf32> to vector<2x880xf32>
    %129 = vector.broadcast %127 : vector<2x1xf32> to vector<2x880xf32>
    %130 = arith.addf %128, %129 : vector<2x880xf32>
    %cst_38 = arith.constant 4.000000e-02 : f32
    %131 = vector.broadcast %cst_38 : f32 to vector<2x880xf32>
    %132 = arith.mulf %131, %130 : vector<2x880xf32>
    %133 = math.floor %132 : vector<2x880xf32>
    %134 = arith.subf %132, %133 : vector<2x880xf32>
    %cst_39 = arith.constant 6.28318548 : f32
    %135 = vector.broadcast %cst_39 : f32 to vector<2x880xf32>
    %136 = arith.mulf %135, %134 : vector<2x880xf32>
    %cst_40 = arith.constant 0.000000e+00 : f32
    %137 = vector.broadcast %cst_40 : f32 to vector<2x880xf32>
    %138 = arith.addf %136, %137 : vector<2x880xf32>
    %139 = math.sin %138 : vector<2x880xf32>
    %cst_41 = arith.constant 1.000000e+00 : f32
    %140 = vector.broadcast %cst_41 : f32 to vector<2x880xf32>
    %141 = arith.addf %140, %139 : vector<2x880xf32>
    %cst_42 = arith.constant 5.000000e-01 : f32
    %142 = vector.broadcast %cst_42 : f32 to vector<2x880xf32>
    %143 = arith.mulf %142, %141 : vector<2x880xf32>
    %cst_43 = arith.constant 2.500000e-01 : f32
    %144 = vector.broadcast %cst_43 : f32 to vector<2x880xf32>
    %145 = arith.addf %143, %144 : vector<2x880xf32>
    %146 = arith.mulf %123, %145 : vector<2x880xf32>
    %147 = arith.cmpf olt, %96, %146 : vector<2x880xf32>
    %c100_i32 = arith.constant 100 : i32
    %148 = vector.broadcast %c100_i32 : i32 to vector<1x880xi32>
    %149 = arith.cmpi slt, %0, %148 : vector<1x880xi32>
    %150 = vector.broadcast %149 : vector<1x880xi1> to vector<2x880xi1>
    %151 = arith.andi %147, %150 : vector<2x880xi1>
    %152 = arith.extui %151 : vector<2x880xi1> to vector<2x880xi32>
    %153 = arith.sitofp %152 : vector<2x880xi32> to vector<2x880xf32>
    %c0_44 = arith.constant 0 : index
    %c0_45 = arith.constant 0 : index
    %154 = vector.load %arg6[%c0_44, %c0_45] : memref<2x880xf32, #tpu.memory_space<vmem>>, vector<2x880xf32>
    tpu.vector_store %arg6[%c0_44, %c0_45], %153 {strides = array<i32>} : memref<2x880xf32, #tpu.memory_space<vmem>>, vector<2x880xf32>,
    return
  }
  func.func @transform_0(%arg0: i32, %arg1: i32, %arg2: memref<1xi32, #tpu.memory_space<smem>>) -> (i32, i32) {
    %c0_i32 = arith.constant 0 : i32
    %c0_i32_0 = arith.constant 0 : i32
    return %arg0, %c0_i32 : i32, i32
  }
  func.func @transform_1(%arg0: i32, %arg1: i32, %arg2: memref<1xi32, #tpu.memory_space<smem>>) -> (i32, i32) {
    %c0_i32 = arith.constant 0 : i32
    %c0_i32_0 = arith.constant 0 : i32
    return %c0_i32, %arg1 : i32, i32
  }
  func.func @transform_2(%arg0: i32, %arg1: i32, %arg2: memref<1xi32, #tpu.memory_space<smem>>) -> (i32, i32) {
    %c0_i32 = arith.constant 0 : i32
    %c0_i32_0 = arith.constant 0 : i32
    return %c0_i32, %arg1 : i32, i32
  }
  func.func @transform_3(%arg0: i32, %arg1: i32, %arg2: memref<1xi32, #tpu.memory_space<smem>>) -> (i32, i32) {
    %c0_i32 = arith.constant 0 : i32
    return %arg0, %arg1 : i32, i32
  }
}

</mosaic_0001>

<bundles_post_ra>
// kernel: tpu_custom_call.1
= control target key start
LH: loop header
LB: loop body
LE: loop exit
PB: predicated region body
PF: predicated region fallthrough
CT: control target
= control target key end

     0   :  { %10 = vsyncpa [#allocation5], 0  ;;  %s3253_s0 = inlined_call_operand.<no memory space> [shape: s32[1], index: 0, kind: input, shape index: {}]   ;;  %s3254_s1 = inlined_call_operand.vmem [shape: s32[2,1], index: 1, kind: input, shape index: {}]   ;;  %s3255_s2 = inlined_call_operand.hbm [shape: s32[1,880], index: 2, kind: input, shape index: {}]   ;;  %s3256_s3 = inlined_call_operand.hbm [shape: s32[1,880], index: 3, kind: input, shape index: {}]   ;;  %s3257_s4 = inlined_call_operand.hbm [shape: f32[2,880], index: 4, kind: output, shape index: {}]  }
   0x1   :  { %11 = vsyncpa [#allocation8], 0 }
   0x2   :  { %12 = vsyncpa [#allocation6], 0  ;;  %s20_s17 = sshll.u32 %s3255_s2, 4  ;;  %s1813_s18 = smov [#allocation4]   ;;  %s21_s17 = int_to_ptr.hbm [resolvable:$true] %s20_s17 }
   0x3   :  { %s22_s19 = sshll.u32 %s1813_s18, 4  ;;  %s31_s22 = sshll.u32 %s3256_s3, 4  ;;  %s23_s19 = int_to_ptr.vmem [resolvable:$true] %s22_s19  ;;  %s32_s22 = int_to_ptr.hbm [resolvable:$true] %s31_s22 }
   0x4   :  { %25 = dma.hbm_to_vmem [thread:$0]  %s21_s17, 112, %s23_s19, [#allocation5]  }
   0x5   :  { %s1814_s23 = smov [#allocation7]  }
   0x6   :  { %s33_s24 = sshll.u32 %s1814_s23, 4  ;;  %s34_s24 = int_to_ptr.vmem [resolvable:$true] %s33_s24 }
   0x7   :  { %36 = dma.hbm_to_vmem [thread:$0]  %s32_s22, 112, %s34_s24, [#allocation8]  }
   0x8   :  { %1807 = dma.done.wait [#allocation5], 112  }
   0x9   :  { %1808 = vsyncadd [#allocation5], 4294967184 }
   0xa   :  { %1809 = dma.done.wait [#allocation8], 112  }
   0xb   :  { %1810 = vsyncadd [#allocation8], 4294967184  ;;  %v49_v0 = vlaneseq  ;;  %v3273_v1 = vmov 0   ;;  %s71_s3 = sxor.u32 1540483477, %s3253_s0  ;;  %s1823_s11 = smov [#allocation9]  }
   0xc   :  { %1733 = vset.pattern.permute.xlu0 %v3273_v1  ;;  %v47_v4 = vld [vmem:[%s3254_s1] sm:$0x3]  ;;  %s72_s28 = sshra.s32 %s71_s3, 16  ;;  %v3266_v28 = vmov 2102212464   ;;  %s1629_s12 = sshll.u32 %s1823_s11, 4  ;;  %s1630_s12 = int_to_ptr.vmem [resolvable:$true] %s1629_s12 }
   0xd   :  { %v67_v2 = vshrl.u32 %v49_v0, 7  ;;  %v45_v5 = vld [vmem:[#allocation4] sm:$0x7f]  ;;  %314 = vperm.xlu0 %1733, %v47_v4   ;;  %s73_s29 = sand.u32 65535, %s72_s28  ;;  %v3264_v30 = vmov 920167782  }
   0xe   :  { %v1863_v6 = vcvt.s32.f32 %v45_v5  ;;  %s74_s30 = sxor.u32 %s73_s29, %s71_s3  ;;  %v3262_v33 = vmov 1326507024   ;;  %v3275_v37 = vmov 683565275   ;;  %v3270_v39 = vmov 2475754826  }
   0xf   :  { %v380_v3 = vcvt.s32.f32 %v67_v2  ;;  %s75_s5 = smul.u32 2246822507, %s74_s30  ;;  %v83_v17 = vmul.u32 2654435769, %v67_v2  ;;  %v3268_v42 = vmov 2131351028  }
  0x10   :  { %v383_v8 = vperm.slane %v1863_v6, 0  ;;  %v384_v54 = vperm.slane %v1863_v6, 1  ;;  %v50_v60 = vand.u32 127, %v49_v0  ;;  %s1631_s15 = sshll.u32 %s3257_s4, 4  ;;  %s1632_s15 = int_to_ptr.hbm [resolvable:$true] %s1631_s15 }
  0x11   :  { %v1865_v7 = vmul.f32 110.0, %v380_v3  ;;  %s76_s0 = sshra.s32 %s75_s5, 13 }
  0x12   :  { %s77_s6 = sand.u32 524287, %s76_s0  ;;  %v51_v0 = vadd.s32 128, %v50_v60 }
  0x13   :  { %v397_v9 = vadd.f32 %v383_v8, %v1865_v7  ;;  %s78_s1 = sxor.u32 %s77_s6, %s75_s5  ;;  %v398_v2 = vadd.f32 %v384_v54, %v1865_v7  ;;  %v52_v8 = vadd.s32 256, %v50_v60 }
  0x14   :  { %s79_s7 = smul.u32 3266489909, %s78_s1 }
  0x15   :  { %v404_v10 = vmul.f32 0.04, %v397_v9 }
  0x16   :  { %s80_s8 = sshra.s32 %s79_s7, 16 }
  0x17   :  { %v411_v11 = vfloor.f32 %v404_v10  ;;  %s81_s9 = sand.u32 65535, %s80_s8 }
  0x18   :  { %s82_s10 = sxor.u32 %s81_s9, %s79_s7 }
  0x19   :  { %v418_v12 = vsub.f32 %v404_v10, %v411_v11  ;;  %v84_v19 = vstv %s82_s10  ;;  %v53_v10 = vadd.s32 384, %v50_v60  ;;  %v405_v11 = vmul.f32 0.04, %v398_v2 }
  0x1a   :  { %v85_v20 = vxor.u32 %v84_v19, %v83_v17  ;;  %v55_v17 = vadd.s32 640, %v50_v60  ;;  %v388_v2 = vperm.slane %v1863_v6, 5 }
  0x1b   :  { %v1869_v13 = vmul.f32 6.2831855, %v418_v12 }
  0x1c   :  { %v1642_v21 = vshrl.u32 %v85_v20, 16 }
  0x1d   :  { %v442_v14 = vand.u32 2139095040, %v1869_v13  ;;  %v3258_v35 = vand.u32 2147483647, %v1869_v13 }
  0x1e   :  { %v88_v23 = vxor.u32 %v1642_v21, %v85_v20 }
  0x1f   :  { %v443_v15 = vshrl.u32 %v442_v14, 23  ;;  %v446_v49 = vand.u32 8388607, %v3258_v35 }
  0x20   :  { %v89_v25 = vmul.u32 2246822507, %v88_v23  ;;  %v412_v23 = vfloor.f32 %v405_v11 }
  0x21   :  { %v1694_v16 = vadd.s32 4294967169, %v443_v15  ;;  %v447_v57 = vor.u32 8388608, %v446_v49 }
  0x22   :  { %v1643_v27 = vshrl.u32 %v89_v25, 13 }
  0x23   :  { %v449_v18 = vadd.s32 1, %v1694_v16  ;;  %v1924_v3 = vshll.u32 %v447_v57, 8  ;;  %v54_v16 = vadd.s32 512, %v50_v60 }
  0x24   :  { %v92_v46 = vxor.u32 %v1643_v27, %v89_v25 }
  0x25   :  { %vm450_vm0 = vcmp.gt.s32.totalorder %v449_v18, 0  ;;  %v488_v12 = vand.u32 65535, %v1924_v3 }
  0x26   :  { %v451_v22 = vsel %vm450_vm0, %v449_v18, 0  ;;  %v93_v53 = vmul.u32 3266489909, %v92_v46  ;;  %v56_v18 = vadd.s32 768, %v50_v60 }
  0x27   :  { %v453_v24 = vand.u32 31, %v451_v22  ;;  %v1881_v36 = vshrl.u32 %v451_v22, 5 }
  0x28   :  { %v1644_v61 = vshrl.u32 %v93_v53, 16 }
  0x29   :  { %v1872_v26 = vsub.s32 32, %v453_v24  ;;  %v465_v29 = vshll.u32 %v3266_v28, %v453_v24  ;;  %v468_v32 = vshll.u32 %v3264_v30, %v453_v24  ;;  %v456_v38 = vshll.u32 %v3275_v37, %v453_v24 }
  0x2a   :  { %v459_v40 = vshll.u32 %v3270_v39, %v453_v24  ;;  %v462_v44 = vshll.u32 %v3268_v42, %v453_v24  ;;  %vm474_vm1 = vcmp.lt.s32.totalorder %v1881_v36, 4  ;;  %vm471_vm2 = vcmp.lt.s32.totalorder %v1881_v36, 1 }
  0x2b   :  { %v466_v31 = vshrl.u32 %v3264_v30, %v1872_v26  ;;  %v469_v34 = vshrl.u32 %v3262_v33, %v1872_v26  ;;  %v457_v41 = vshrl.u32 %v3270_v39, %v1872_v26  ;;  %v460_v43 = vshrl.u32 %v3268_v42, %v1872_v26 }
  0x2c   :  { %v463_v45 = vshrl.u32 %v3266_v28, %v1872_v26  ;;  %vm473_vm3 = vcmp.lt.s32.totalorder %v1881_v36, 3  ;;  %vm472_vm4 = vcmp.lt.s32.totalorder %v1881_v36, 2  ;;  %v1934_v9 = vxor.u32 %v1644_v61, %v93_v53 }
  0x2d   :  { %v467_v47 = vor.u32 %v466_v31, %v465_v29  ;;  %v470_v48 = vor.u32 %v469_v34, %v468_v32  ;;  %v1895_v50 = vor.u32 %v457_v41, %v456_v38  ;;  %v1897_v51 = vor.u32 %v460_v43, %v459_v40 }
  0x2e   :  { %v1899_v52 = vor.u32 %v463_v45, %v462_v44  ;;  %v97_v19 = vxor.u32 %v1934_v9, %v50_v60  ;;  %v98_v20 = vxor.u32 %v1934_v9, %v51_v0  ;;  %v99_v21 = vxor.u32 %v1934_v9, %v52_v8 }
  0x2f   :  { %v480_v55 = vsel %vm474_vm1, %v467_v47, 920167782  ;;  %v484_v56 = vsel %vm474_vm1, %v470_v48, 1326507024  ;;  %v479_v58 = vsel %vm471_vm2, %v1895_v50, %v1897_v51  ;;  %v100_v22 = vxor.u32 %v1934_v9, %v53_v10 }
  0x30   :  { %v483_v59 = vsel %vm471_vm2, %v1897_v51, %v1899_v52  ;;  %v481_v62 = vsel %vm473_vm3, %v1899_v52, %v480_v55  ;;  %v485_v63 = vsel %vm473_vm3, %v467_v47, %v484_v56  ;;  %v489_v24 = vshrl.u32 %v1924_v3, 16 }
  0x31   :  { %v1928_v4 = vsel %vm472_vm4, %v479_v58, %v481_v62  ;;  %v1932_v5 = vsel %vm472_vm4, %v483_v59, %v485_v63  ;;  %v101_v32 = vxor.u32 %v1934_v9, %v54_v16  ;;  %v102_v34 = vxor.u32 %v1934_v9, %v55_v17 }
  0x32   :  { %v491_v14 = vshrl.u32 %v1932_v5, 16  ;;  %v513_v15 = vshrl.u32 %v1928_v4, 16  ;;  %v490_v25 = vand.u32 65535, %v1932_v5  ;;  %v512_v29 = vand.u32 65535, %v1928_v4 }
  0x33   :  { %v103_v38 = vxor.u32 %v1934_v9, %v56_v18  ;;  %v385_v40 = vperm.slane %v1863_v6, 2  ;;  %v1645_v41 = vshrl.u32 %v97_v19, 16  ;;  %v1646_v43 = vshrl.u32 %v98_v20, 16 }
  0x34   :  { %v1945_v27 = vmul.u32 %v491_v14, %v488_v12  ;;  %v1948_v31 = vmul.u32 %v513_v15, %v488_v12  ;;  %v1647_v44 = vshrl.u32 %v99_v21, 16  ;;  %v386_v45 = vperm.slane %v1863_v6, 3 }
  0x35   :  { %v1648_v46 = vshrl.u32 %v100_v22, 16  ;;  %v419_v47 = vsub.f32 %v405_v11, %v412_v23  ;;  %v492_v48 = vmul.u32 %v490_v25, %v488_v12  ;;  %v1955_v49 = vmul.u32 %v490_v25, %v489_v24 }
  0x36   :  { %v496_v53 = vshll.u32 %v1945_v27, 16  ;;  %v514_v54 = vmul.u32 %v512_v29, %v488_v12  ;;  %v1958_v55 = vmul.u32 %v512_v29, %v489_v24  ;;  %v518_v56 = vshll.u32 %v1948_v31, 16 }
  0x37   :  { %v1649_v57 = vshrl.u32 %v101_v32, 16  ;;  %v1650_v58 = vshrl.u32 %v102_v34, 16  ;;  %v1651_v59 = vshrl.u32 %v103_v38, 16  ;;  %v387_v60 = vperm.slane %v1863_v6, 4 }
  0x38   :  { %v118_v61 = vxor.u32 %v1645_v41, %v97_v19  ;;  %v119_v62 = vxor.u32 %v1646_v43, %v98_v20  ;;  %v120_v63 = vxor.u32 %v1647_v44, %v99_v21  ;;  %v121_v4 = vxor.u32 %v1648_v46, %v100_v22 }
  0x39   :  { %v389_v5 = vperm.slane %v1863_v6, 6  ;;  %v399_v0 = vadd.f32 %v385_v40, %v1865_v7  ;;  %v1965_v8 = vmul.f32 6.2831855, %v419_v47  ;;  %v498_v10 = vshll.u32 %v1955_v49, 16 }
  0x3a   :  { %vm1968_vm5 = vc.u32 %v492_v48, %v496_v53  ;;  %v520_v12 = vshll.u32 %v1958_v55, 16  ;;  %vm522_vm6 = vc.u32 %v514_v54, %v518_v56  ;;  %v122_v16 = vxor.u32 %v1649_v57, %v101_v32 }
  0x3b   :  { %v123_v17 = vxor.u32 %v1650_v58, %v102_v34  ;;  %v124_v18 = vxor.u32 %v1651_v59, %v103_v38  ;;  %v1973_v19 = vadd.s32 %v518_v56, %v514_v54  ;;  %v125_v20 = vmul.u32 2246822507, %v118_v61 }
  0x3c   :  { %v126_v6 = vmul.u32 2246822507, %v119_v62  ;;  %v127_v21 = vmul.u32 2246822507, %v120_v63  ;;  %v502_v22 = vadd.s32 %v496_v53, %v492_v48  ;;  %v128_v23 = vmul.u32 2246822507, %v121_v4 }
  0x3d   :  { %v400_v25 = vadd.f32 %v386_v45, %v1865_v7  ;;  %v401_v29 = vadd.f32 %v387_v60, %v1865_v7  ;;  %v517_v40 = vmul.u32 %v513_v15, %v489_v24  ;;  %v495_v41 = vmul.u32 %v491_v14, %v489_v24 }
  0x3e   :  { %v501_v43 = vsel %vm1968_vm5, 1, %v3273_v1  ;;  %v523_v32 = vsel %vm522_vm6, 1, %v3273_v1  ;;  %v597_v34 = vand.u32 2139095040, %v1965_v8  ;;  %v129_v38 = vmul.u32 2246822507, %v122_v16 }
  0x3f   :  { %v130_v44 = vmul.u32 2246822507, %v123_v17  ;;  %v131_v46 = vmul.u32 2246822507, %v124_v18  ;;  %vm526_vm7 = vc.u32 %v1973_v19, %v520_v12  ;;  %v1652_v45 = vshrl.u32 %v125_v20, 13 }
  0x40   :  { %v1653_v47 = vshrl.u32 %v126_v6, 13  ;;  %v1654_v48 = vshrl.u32 %v127_v21, 13  ;;  %vm504_vm8 = vc.u32 %v502_v22, %v498_v10  ;;  %v1655_v14 = vshrl.u32 %v128_v23, 13 }
  0x41   :  { %v402_v15 = vadd.f32 %v388_v2, %v1865_v7  ;;  %v403_v24 = vadd.f32 %v389_v5, %v1865_v7  ;;  %v525_v53 = vadd.s32 %v523_v32, %v517_v40  ;;  %v406_v54 = vmul.f32 0.04, %v399_v0 }
  0x42   :  { %v503_v56 = vadd.s32 %v501_v43, %v495_v41  ;;  %v527_v57 = vsel %vm526_vm7, 1, %v3273_v1  ;;  %v598_v58 = vshrl.u32 %v597_v34, 23  ;;  %v1656_v59 = vshrl.u32 %v129_v38, 13 }
  0x43   :  { %v1657_v60 = vshrl.u32 %v130_v44, 13  ;;  %v1658_v61 = vshrl.u32 %v131_v46, 13  ;;  %v505_v62 = vsel %vm504_vm8, 1, %v3273_v1  ;;  %v146_v63 = vxor.u32 %v1652_v45, %v125_v20 }
  0x44   :  { %v147_v4 = vxor.u32 %v1653_v47, %v126_v6  ;;  %v148_v11 = vxor.u32 %v1654_v48, %v127_v21  ;;  %v407_v10 = vmul.f32 0.04, %v400_v25  ;;  %v149_v16 = vxor.u32 %v1655_v14, %v128_v23 }
  0x45   :  { %v408_v17 = vmul.f32 0.04, %v401_v29  ;;  %v519_v2 = vshrl.u32 %v1948_v31, 16  ;;  %v529_v7 = vadd.s32 %v527_v57, %v525_v53  ;;  %v409_v5 = vmul.f32 0.04, %v402_v15 }
  0x46   :  { %v497_v0 = vshrl.u32 %v1945_v27, 16  ;;  %v507_v18 = vadd.s32 %v505_v62, %v503_v56  ;;  %v1697_v22 = vadd.s32 4294967169, %v598_v58  ;;  %v150_v40 = vxor.u32 %v1656_v59, %v129_v38 }
  0x47   :  { %v151_v41 = vxor.u32 %v1657_v60, %v130_v44  ;;  %v152_v43 = vxor.u32 %v1658_v61, %v131_v46  ;;  %v410_v32 = vmul.f32 0.04, %v403_v24  ;;  %v153_v34 = vmul.u32 3266489909, %v146_v63 }
  0x48   :  { %v154_v35 = vmul.u32 3266489909, %v147_v4  ;;  %v155_v20 = vmul.u32 3266489909, %v148_v11  ;;  %v156_v6 = vmul.u32 3266489909, %v149_v16  ;;  %v455_v21 = vshrl.u32 %v3275_v37, %v1872_v26 }
  0x49   :  { %v521_v23 = vshrl.u32 %v1958_v55, 16  ;;  %v530_v31 = vadd.s32 %v529_v7, %v519_v2  ;;  %v476_v27 = vsel %vm474_vm1, %v1899_v52, 2102212464  ;;  %v499_v25 = vshrl.u32 %v1955_v49, 16 }
  0x4a   :  { %v508_v29 = vadd.s32 %v507_v18, %v497_v0  ;;  %v604_v38 = vadd.s32 1, %v1697_v22  ;;  %v157_v44 = vmul.u32 3266489909, %v150_v40  ;;  %v158_v46 = vmul.u32 3266489909, %v151_v41 }
  0x4b   :  { %v159_v45 = vmul.u32 3266489909, %v152_v43  ;;  %v1659_v47 = vshrl.u32 %v153_v34, 16  ;;  %v1660_v48 = vshrl.u32 %v154_v35, 16  ;;  %v1661_v14 = vshrl.u32 %v155_v20, 16 }
  0x4c   :  { %v413_v15 = vfloor.f32 %v406_v54  ;;  %v1662_v24 = vshrl.u32 %v156_v6, 16  ;;  %v414_v26 = vfloor.f32 %v407_v10  ;;  %v415_v53 = vfloor.f32 %v408_v17 }
  0x4d   :  { %v531_v56 = vadd.s32 %v530_v31, %v521_v23  ;;  %v475_v57 = vsel %vm471_vm2, %v455_v21, %v1895_v50  ;;  %v477_v52 = vsel %vm473_vm3, %v1897_v51, %v476_v27  ;;  %v509_v49 = vadd.s32 %v508_v29, %v499_v25 }
  0x4e   :  { %v528_v58 = vadd.s32 %v1973_v19, %v520_v12  ;;  %v1663_v59 = vshrl.u32 %v157_v44, 16  ;;  %v1664_v60 = vshrl.u32 %v158_v46, 16  ;;  %v1665_v61 = vshrl.u32 %v159_v45, 16 }
  0x4f   :  { %vm605_vm9 = vcmp.gt.s32.totalorder %v604_v38, 0  ;;  %v174_v62 = vxor.u32 %v1659_v47, %v153_v34  ;;  %v175_v63 = vxor.u32 %v1660_v48, %v154_v35  ;;  %v176_v4 = vxor.u32 %v1661_v14, %v155_v20 }
  0x50   :  { %v416_v11 = vfloor.f32 %v409_v5  ;;  %v177_v16 = vxor.u32 %v1662_v24, %v156_v6  ;;  %v417_v2 = vfloor.f32 %v410_v32  ;;  %v478_v50 = vsel %vm472_vm4, %v475_v57, %v477_v52 }
  0x51   :  { %v535_v7 = vadd.s32 1, %v531_v56  ;;  %v420_v51 = vsub.f32 %v406_v54, %v413_v15  ;;  %vm534_vm10 = vc.u32 %v509_v49, %v528_v58  ;;  %v3261_v55 = vand.u32 2147483647, %v1965_v8 }
  0x52   :  { %v606_v0 = vsel %vm605_vm9, %v604_v38, 0  ;;  %v178_v12 = vxor.u32 %v1663_v59, %v157_v44  ;;  %v179_v19 = vxor.u32 %v1664_v60, %v158_v46  ;;  %v180_v18 = vxor.u32 %v1665_v61, %v159_v45 }
  0x53   :  { %v421_v22 = vsub.f32 %v407_v10, %v414_v26  ;;  %v181_v40 = vadd.s32 %v174_v62, %v1934_v9  ;;  %v182_v35 = vadd.s32 %v175_v63, %v1934_v9  ;;  %v183_v41 = vadd.s32 %v176_v4, %v1934_v9  ;;  %v2036_v26 = vld [vmem:[#allocation7] sm:$0x7f] }
  0x54   :  { %v532_v43 = vmul.u32 %v1924_v3, %v478_v50  ;;  %v184_v36 = vadd.s32 %v177_v16, %v1934_v9  ;;  %v422_v34 = vsub.f32 %v408_v17, %v415_v53  ;;  %v536_v54 = vsel %vm534_vm10, %v535_v7, %v531_v56 }
  0x55   :  { %v608_v20 = vand.u32 31, %v606_v0  ;;  %v423_v6 = vsub.f32 %v409_v5, %v416_v11  ;;  %v424_v21 = vsub.f32 %v410_v32, %v417_v2  ;;  %v601_v23 = vand.u32 8388607, %v3261_v55 }
  0x56   :  { %v185_v10 = vadd.s32 %v178_v12, %v1934_v9  ;;  %v186_v31 = vadd.s32 %v179_v19, %v1934_v9  ;;  %v187_v27 = vadd.s32 %v180_v18, %v1934_v9  ;;  %v2020_v25 = vmul.f32 6.2831855, %v420_v51 }
  0x57   :  { %v1666_v29 = vshrl.u32 %v181_v40, 16  ;;  %v1667_v3 = vshrl.u32 %v182_v35, 16  ;;  %v1668_v38 = vshrl.u32 %v183_v41, 16  ;;  %v2022_v44 = vadd.s32 %v536_v54, %v532_v43 }
  0x58   :  { %v1669_v17 = vshrl.u32 %v184_v36, 16  ;;  %v2024_v46 = vmul.f32 6.2831855, %v421_v22  ;;  %v2026_v5 = vmul.f32 6.2831855, %v422_v34  ;;  %v2028_v32 = vsub.s32 32, %v608_v20 }
  0x59   :  { %v2030_v45 = vmul.f32 6.2831855, %v423_v6  ;;  %v2032_v47 = vmul.f32 6.2831855, %v424_v21  ;;  %v602_v48 = vor.u32 8388608, %v601_v23  ;;  %v1670_v9 = vshrl.u32 %v185_v10, 16 }
  0x5a   :  { %3297 = vst [vmem:[#allocation13_spill] sm:$0xff] %v2024_v46  ;;  %v1671_v14 = vshrl.u32 %v186_v31, 16  ;;  %v1672_v15 = vshrl.u32 %v187_v27, 16  ;;  %v2034_v24 = vadd.s32 %v528_v58, %v509_v49  ;;  %v202_v53 = vxor.u32 %v1666_v29, %v181_v40 }
  0x5b   :  { %v203_v56 = vxor.u32 %v1667_v3, %v182_v35  ;;  %v204_v57 = vxor.u32 %v1668_v38, %v183_v41  ;;  %v538_v52 = vadd.s32 536870912, %v2022_v44  ;;  %v205_v59 = vxor.u32 %v1669_v17, %v184_v36 }
  0x5c   :  { %v2039_v60 = vshrl.u32 %v606_v0, 5  ;;  %v620_v61 = vshll.u32 %v3266_v28, %v608_v20  ;;  %v621_v62 = vshrl.u32 %v3264_v30, %v2028_v32  ;;  %v611_v63 = vshll.u32 %v3275_v37, %v608_v20 }
  0x5d   :  { %v612_v49 = vshrl.u32 %v3270_v39, %v2028_v32  ;;  %v614_v58 = vshll.u32 %v3270_v39, %v608_v20  ;;  %v615_v4 = vshrl.u32 %v3268_v42, %v2028_v32  ;;  %v206_v11 = vxor.u32 %v1670_v9, %v185_v10 }
  0x5e   :  { %v207_v16 = vxor.u32 %v1671_v14, %v186_v31  ;;  %v208_v2 = vxor.u32 %v1672_v15, %v187_v27  ;;  %v293_v50 = vshra.s32 %v2036_v26, 1  ;;  %v209_v7 = vmul.u32 2246822507, %v202_v53 }
  0x5f   :  { %v210_v51 = vmul.u32 2246822507, %v203_v56  ;;  %v617_v0 = vshll.u32 %v3268_v42, %v608_v20  ;;  %v618_v12 = vshrl.u32 %v3266_v28, %v2028_v32  ;;  %v211_v19 = vmul.u32 2246822507, %v204_v57 }
  0x60   :  { %v212_v18 = vmul.u32 2246822507, %v205_v59  ;;  %v622_v22 = vor.u32 %v621_v62, %v620_v61  ;;  %v623_v40 = vshll.u32 %v3264_v30, %v608_v20  ;;  %v2055_v35 = vor.u32 %v612_v49, %v611_v63 }
  0x61   :  { %v2057_v41 = vor.u32 %v615_v4, %v614_v58  ;;  %v624_v43 = vshrl.u32 %v3262_v33, %v2028_v32  ;;  %vm629_vm11 = vcmp.lt.s32.totalorder %v2039_v60, 4  ;;  %v213_v36 = vmul.u32 2246822507, %v206_v11 }
  0x62   :  { %v214_v34 = vmul.u32 2246822507, %v207_v16  ;;  %v2062_v54 = vshrl.u32 %v538_v52, 30  ;;  %vm626_vm12 = vcmp.lt.s32.totalorder %v2039_v60, 1  ;;  %v215_v6 = vmul.u32 2246822507, %v208_v2 }
  0x63   :  { %v1673_v21 = vshrl.u32 %v209_v7, 13  ;;  %v2065_v23 = vshra.s32 %v293_v50, 4  ;;  %v2067_v20 = vor.u32 %v618_v12, %v617_v0  ;;  %v1674_v10 = vshrl.u32 %v210_v51, 13 }
  0x64   :  { %vm628_vm13 = vcmp.lt.s32.totalorder %v2039_v60, 3  ;;  %v635_v31 = vsel %vm629_vm11, %v622_v22, 920167782  ;;  %v2072_v27 = vshll.u32 %v602_v48, 8  ;;  %v1675_v29 = vshrl.u32 %v211_v19, 13 }
  0x65   :  { %v625_v3 = vor.u32 %v624_v43, %v623_v40  ;;  %vm627_vm14 = vcmp.lt.s32.totalorder %v2039_v60, 2  ;;  %v634_v38 = vsel %vm626_vm12, %v2055_v35, %v2057_v41  ;;  %v1676_v17 = vshrl.u32 %v212_v18, 13 }
  0x66   :  { %v1677_v9 = vshrl.u32 %v213_v36, 13  ;;  %v1678_v14 = vshrl.u32 %v214_v34, 13  ;;  %v2080_v15 = vand.u32 1, %v2036_v26  ;;  %v1679_v53 = vshrl.u32 %v215_v6, 13 }
  0x67   :  { %v2082_v56 = vxor.u32 %v1673_v21, %v209_v7  ;;  %v636_v48 = vsel %vm628_vm13, %v2067_v20, %v635_v31  ;;  %v752_v57 = vand.u32 2139095040, %v2020_v25  ;;  %v2088_v52 = vxor.u32 %v1674_v10, %v210_v51 }
  0x68   :  { %3298 = vst [vmem:[#allocation14_spill] sm:$0xff] %v2080_v15  ;;  %v637_v59 = vsel %vm627_vm14, %v634_v38, %v636_v48  ;;  %v643_v61 = vand.u32 65535, %v2072_v27  ;;  %v644_v62 = vshrl.u32 %v2072_v27, 16  ;;  %v2094_v26 = vxor.u32 %v1675_v29, %v211_v19 }
  0x69   :  { %v638_v63 = vsel %vm626_vm12, %v2057_v41, %v2067_v20  ;;  %v639_v49 = vsel %vm629_vm11, %v625_v3, 1326507024  ;;  %v667_v58 = vand.u32 65535, %v637_v59  ;;  %v2102_v4 = vxor.u32 %v1676_v17, %v212_v18 }
  0x6a   :  { %v2104_v11 = vxor.u32 %v1677_v9, %v213_v36  ;;  %v640_v16 = vsel %vm628_vm13, %v622_v22, %v639_v49  ;;  %v668_v2 = vshrl.u32 %v637_v59, 16  ;;  %v2108_v7 = vxor.u32 %v1678_v14, %v214_v34 }
  0x6b   :  { %v2110_v51 = vxor.u32 %v1679_v53, %v215_v6  ;;  %v2112_v0 = vand.u32 15, %v293_v50  ;;  %v753_v12 = vshrl.u32 %v752_v57, 23  ;;  %v641_v19 = vsel %vm627_vm14, %v638_v63, %v640_v16 }
  0x6c   :  { %3299 = vst [vmem:[#allocation15_spill] sm:$0xff] %v2104_v11  ;;  %v669_v40 = vmul.u32 %v667_v58, %v643_v61  ;;  %v670_v43 = vmul.u32 %v668_v2, %v643_v61  ;;  %v2116_v18 = vmul.u32 %v667_v58, %v644_v62  ;;  %v237_v36 = vmul.u32 3266489909, %v2082_v56 }
  0x6d   :  { %3300 = vst [vmem:[#allocation16_spill] sm:$0xff] %v2110_v51  ;;  %v238_v21 = vmul.u32 3266489909, %v2088_v52  ;;  %v645_v22 = vand.u32 65535, %v641_v19  ;;  %v646_v10 = vshrl.u32 %v641_v19, 16  ;;  %v540_v6 = vshll.u32 %v2062_v54, 30 }
  0x6e   :  { %3301 = vst [vmem:[#allocation17_spill] sm:$0xff] %v2112_v0  ;;  %v239_v34 = vmul.u32 3266489909, %v2094_v26  ;;  %v673_v50 = vshll.u32 %v670_v43, 16  ;;  %v675_v31 = vshll.u32 %v2116_v18, 16  ;;  %v672_v17 = vmul.u32 %v668_v2, %v644_v62 }
  0x6f   :  { %v647_v29 = vmul.u32 %v645_v22, %v643_v61  ;;  %v648_v3 = vmul.u32 %v646_v10, %v643_v61  ;;  %v649_v38 = vmul.u32 %v645_v22, %v644_v62  ;;  %v240_v9 = vmul.u32 3266489909, %v2102_v4 }
  0x70   :  { %vm297_vm15 = vcmp.eq.s32.totalorder %v2065_v23, 0  ;;  %vm677_vm0 = vc.u32 %v669_v40, %v673_v50  ;;  %v679_v14 = vadd.s32 %v673_v50, %v669_v40  ;;  %v1700_v53 = vadd.s32 4294967169, %v753_v12 }
  0x71   :  { %v242_v56 = vmul.u32 3266489909, %v2108_v7  ;;  %v650_v48 = vmul.u32 %v646_v10, %v644_v62  ;;  %v651_v57 = vshll.u32 %v648_v3, 16  ;;  %v653_v52 = vshll.u32 %v649_v38, 16 }
  0x72   :  { %v1680_v59 = vshrl.u32 %v237_v36, 16  ;;  %v2127_v26 = vsub.s32 %v2022_v44, %v540_v6  ;;  %v678_v61 = vsel %vm677_vm0, 1, %v3273_v1  ;;  %vm681_vm1 = vc.u32 %v679_v14, %v675_v31 }
  0x73   :  { %v1681_v63 = vshrl.u32 %v238_v21, 16  ;;  %vm655_vm2 = vc.u32 %v647_v29, %v651_v57  ;;  %v657_v49 = vadd.s32 %v651_v57, %v647_v29  ;;  %v680_v58 = vadd.s32 %v678_v61, %v672_v17 }
  0x74   :  { %v656_v16 = vsel %vm655_vm2, 1, %v3273_v1  ;;  %v674_v2 = vshrl.u32 %v670_v43, 16  ;;  %v682_v12 = vsel %vm681_vm1, 1, %v3273_v1  ;;  %v759_v19 = vadd.s32 1, %v1700_v53 }
  0x75   :  { %v652_v62 = vshrl.u32 %v648_v3, 16  ;;  %v658_v40 = vadd.s32 %v656_v16, %v650_v48  ;;  %vm659_vm3 = vc.u32 %v657_v49, %v653_v52  ;;  %v684_v22 = vadd.s32 %v682_v12, %v680_v58 }
  0x76   :  { %v543_v44 = vsub.s32 0, %v2127_v26  ;;  %v610_v10 = vshrl.u32 %v3275_v37, %v2028_v32  ;;  %v660_v6 = vsel %vm659_vm3, 1, %v3273_v1  ;;  %vm760_vm4 = vcmp.gt.s32.totalorder %v759_v19, 0 }
  0x77   :  { %vm542_vm5 = vcmp.lt.s32.totalorder %v2127_v26, 0  ;;  %v631_v43 = vsel %vm629_vm11, %v2067_v20, 2102212464  ;;  %v662_v50 = vadd.s32 %v660_v6, %v658_v40  ;;  %v761_v29 = vsel %vm760_vm4, %v759_v19, 0 }
  0x78   :  { %v1682_v3 = vshrl.u32 %v239_v34, 16  ;;  %v676_v17 = vshrl.u32 %v2116_v18, 16  ;;  %v685_v53 = vadd.s32 %v684_v22, %v674_v2  ;;  %v763_v48 = vand.u32 31, %v761_v29 }
  0x79   :  { %v3259_v57 = vmul.u32 3266489909, %v2104_v11  ;;  %v654_v52 = vshrl.u32 %v649_v38, 16  ;;  %v663_v61 = vadd.s32 %v662_v50, %v652_v62  ;;  %v544_v49 = vsel %vm542_vm5, %v543_v44, %v2127_v26 }
  0x7a   :  { %v630_v58 = vsel %vm626_vm12, %v610_v10, %v2055_v35  ;;  %v632_v20 = vsel %vm628_vm13, %v2057_v41, %v631_v43  ;;  %v3260_v18 = vand.u32 2147483647, %v2020_v25  ;;  %v1683_v16 = vshrl.u32 %v240_v9, 16 }
  0x7b   :  { %v1685_v2 = vshrl.u32 %v242_v56, 16  ;;  %v2158_v38 = vsel %vm297_vm15, 1, %v3273_v1  ;;  %v2160_v12 = vsub.s32 32, %v763_v48  ;;  %v258_v35 = vxor.u32 %v1680_v59, %v237_v36 }
  0x7c   :  { %v259_v19 = vxor.u32 %v1681_v63, %v238_v21  ;;  %v260_v62 = vxor.u32 %v1682_v3, %v239_v34  ;;  %v686_v40 = vadd.s32 %v685_v53, %v676_v17  ;;  %v545_v41 = vclz %v544_v49 }
  0x7d   :  { %v633_v22 = vsel %vm627_vm14, %v630_v58, %v632_v20  ;;  %v2164_v44 = vadd.s32 %v663_v61, %v654_v52  ;;  %v2166_v10 = vadd.s32 %v679_v14, %v675_v31  ;;  %v756_v6 = vand.u32 8388607, %v3260_v18 }
  0x7e   :  { %v2170_v23 = vshrl.u32 %v761_v29, 5  ;;  %v766_v43 = vshll.u32 %v3275_v37, %v763_v48  ;;  %v769_v36 = vshll.u32 %v3270_v39, %v763_v48  ;;  %v767_v21 = vshrl.u32 %v3270_v39, %v2160_v12 }
  0x7f   :  { %v770_v60 = vshrl.u32 %v3268_v42, %v2160_v12  ;;  %v772_v34 = vshll.u32 %v3268_v42, %v763_v48  ;;  %v773_v31 = vshrl.u32 %v3266_v28, %v2160_v12  ;;  %v690_v14 = vadd.s32 1, %v686_v40 }
  0x80   :  { %v775_v59 = vshll.u32 %v3266_v28, %v763_v48  ;;  %v776_v63 = vshrl.u32 %v3264_v30, %v2160_v12  ;;  %v778_v50 = vshll.u32 %v3264_v30, %v763_v48  ;;  %v261_v29 = vxor.u32 %v1683_v16, %v240_v9 }
  0x81   :  { %v2189_v3 = vxor.u32 %v1685_v2, %v242_v56  ;;  %vm689_vm6 = vc.u32 %v2164_v44, %v2166_v10  ;;  %v779_v17 = vshrl.u32 %v3262_v33, %v2160_v12  ;;  %v1695_v53 = vadd.s32 4294967294, %v545_v41 }
  0x82   :  { %v687_v52 = vmul.u32 %v2072_v27, %v633_v22  ;;  %v757_v61 = vor.u32 8388608, %v756_v6  ;;  %v777_v49 = vor.u32 %v776_v63, %v775_v59  ;;  %v2196_v58 = vor.u32 %v767_v21, %v766_v43 }
  0x83   :  { %3302 = vst [vmem:[#allocation18_spill] sm:$0xff] %v2189_v3  ;;  %v2198_v48 = vor.u32 %v770_v60, %v769_v36  ;;  %v2200_v4 = vor.u32 %v773_v31, %v772_v34  ;;  %v780_v7 = vor.u32 %v779_v17, %v778_v50  ;;  %v1687_v9 = vshrl.u32 %v258_v35, 8 }
  0x84   :  { %v691_v56 = vsel %vm689_vm6, %v690_v14, %v686_v40  ;;  %vm781_vm7 = vcmp.lt.s32.totalorder %v2170_v23, 1  ;;  %vm784_vm8 = vcmp.lt.s32.totalorder %v2170_v23, 4  ;;  %v1688_v20 = vshrl.u32 %v259_v19, 8 }
  0x85   :  { %v1689_v16 = vshrl.u32 %v260_v62, 8  ;;  %v1690_v2 = vshrl.u32 %v261_v29, 8  ;;  %vm783_vm9 = vcmp.lt.s32.totalorder %v2170_v23, 3  ;;  %vm1696_vm10 = vcmp.lt.s32.totalorder %v1695_v53, 0 }
  0x86   :  { %v790_v27 = vsel %vm784_vm8, %v777_v49, 920167782  ;;  %v794_v41 = vsel %vm784_vm8, %v780_v7, 1326507024  ;;  %v2209_v22 = vshll.u32 %v757_v61, 8  ;;  %v2211_v35 = vadd.s32 %v691_v56, %v687_v52 }
  0x87   :  { %vm782_vm11 = vcmp.lt.s32.totalorder %v2170_v23, 2  ;;  %v789_v19 = vsel %vm781_vm7, %v2196_v58, %v2198_v48  ;;  %v793_v62 = vsel %vm781_vm7, %v2198_v48, %v2200_v4  ;;  %v2224_v40 = vshrl.u32 %v3259_v57, 16 }
  0x88   :  { %v299_v6 = vperm.slane %v2158_v38, 0  ;;  %v791_v43 = vsel %vm783_vm9, %v2200_v4, %v790_v27  ;;  %v795_v36 = vsel %vm783_vm9, %v777_v49, %v794_v41  ;;  %v279_v21 = vcvt.s32.f32 %v1687_v9 }
  0x89   :  { %3303 = vst [vmem:[#allocation19_spill] sm:$0xff] %v2224_v40  ;;  %v280_v60 = vcvt.s32.f32 %v1688_v20  ;;  %v281_v34 = vcvt.s32.f32 %v1689_v16  ;;  %v548_v31 = vsel %vm1696_vm10, 0, %v1695_v53  ;;  %v282_v14 = vcvt.s32.f32 %v1690_v2 }
  0x8a   :  { %v792_v59 = vsel %vm782_vm11, %v789_v19, %v791_v43  ;;  %v796_v63 = vsel %vm782_vm11, %v793_v62, %v795_v36  ;;  %v798_v50 = vand.u32 65535, %v2209_v22  ;;  %v693_v17 = vadd.s32 536870912, %v2211_v35 }
  0x8b   :  { %v799_v52 = vshrl.u32 %v2209_v22, 16  ;;  %v800_v61 = vand.u32 65535, %v796_v63  ;;  %v553_v7 = vsub.s32 4294967266, %v548_v31  ;;  %v801_v9 = vshrl.u32 %v796_v63, 16 }
  0x8c   :  { %v2242_v56 = vmul.f32 5.9604645e-08, %v279_v21  ;;  %v2244_v20 = vmul.f32 5.9604645e-08, %v280_v60  ;;  %v822_v16 = vand.u32 65535, %v792_v59  ;;  %v823_v2 = vshrl.u32 %v792_v59, 16 }
  0x8d   :  { %v2246_v27 = vmul.f32 5.9604645e-08, %v281_v34  ;;  %v2248_v41 = vmul.f32 5.9604645e-08, %v282_v14  ;;  %v2251_v62 = vmul.u32 %v801_v9, %v798_v50  ;;  %v2254_v36 = vshrl.u32 %v693_v17, 30 }
  0x8e   :  { %3304 = vst [vmem:[#allocation20_spill] sm:$0xff] %v2242_v56  ;;  %v802_v29 = vmul.u32 %v800_v61, %v798_v50  ;;  %v2256_v63 = vmul.u32 %v800_v61, %v799_v52  ;;  %v549_v60 = vsub.s32 32, %v548_v31  ;;  %v554_v32 = vadd.s32 127, %v553_v7 }
  0x8f   :  { %3305 = vst [vmem:[#allocation21_spill] sm:$0xff] %v2244_v20  ;;  %v806_v34 = vshll.u32 %v2251_v62, 16  ;;  %v825_v57 = vmul.u32 %v823_v2, %v798_v50  ;;  %v2262_v18 = vmul.u32 %v822_v16, %v799_v52  ;;  %v907_v33 = vand.u32 2139095040, %v2024_v46 }
  0x90   :  { %3306 = vst [vmem:[#allocation22_spill] sm:$0xff] %v2246_v27  ;;  %vm441_vm12 = vcmp.lt.s32.totalorder %v1869_v13, 0  ;;  %v695_v7 = vshll.u32 %v2254_v36, 30  ;;  %v808_v30 = vshll.u32 %v2256_v63, 16  ;;  %v824_v28 = vmul.u32 %v822_v16, %v798_v50 }
  0x91   :  { %3307 = vst [vmem:[#allocation23_spill] sm:$0xff] %v2248_v41  ;;  %vm810_vm13 = vc.u32 %v802_v29, %v806_v34  ;;  %v550_v59 = vshll.u32 %v2127_v26, %v548_v31  ;;  %v551_v42 = vshrl.u32 %v2034_v24, %v549_v60  ;;  %v555_v39 = vshll.u32 %v554_v32, 23 }
  0x92   :  { %v812_v55 = vadd.s32 %v806_v34, %v802_v29  ;;  %v805_v14 = vmul.u32 %v801_v9, %v799_v52  ;;  %v827_v17 = vmul.u32 %v823_v2, %v799_v52  ;;  %v828_v21 = vshll.u32 %v825_v57, 16 }
  0x93   :  { %v830_v61 = vshll.u32 %v2262_v18, 16  ;;  %v811_v53 = vsel %vm810_vm13, 1, %v3273_v1  ;;  %v908_v49 = vshrl.u32 %v907_v33, 23  ;;  %v2278_v50 = vsub.s32 %v2211_v35, %v695_v7 }
  0x94   :  { %vm814_vm14 = vc.u32 %v812_v55, %v808_v30  ;;  %vm832_vm15 = vc.u32 %v824_v28, %v828_v21  ;;  %v834_v24 = vadd.s32 %v828_v21, %v824_v28  ;;  %v3308_v26 = vand.u32 2147483647, %v1869_v13 }
  0x95   :  { %v552_v31 = vor.u32 %v551_v42, %v550_v59  ;;  %v556_v29 = vor.u32 4788187, %v555_v39  ;;  %v563_v52 = vsub.s32 4, %v2062_v54  ;;  %v833_v9 = vsel %vm832_vm15, 1, %v3273_v1 }
  0x96   :  { %vm2282_vm0 = vcmp.le.f32.partialorder %v3308_v26, 0.7853982  ;;  %v813_v16 = vadd.s32 %v811_v53, %v805_v14  ;;  %v835_v33 = vadd.s32 %v833_v9, %v827_v17  ;;  %vm836_vm1 = vc.u32 %v834_v24, %v830_v61 }
  0x97   :  { %v1703_v35 = vadd.s32 4294967169, %v908_v49  ;;  %v815_v55 = vsel %vm814_vm14, 1, %v3273_v1  ;;  %v837_v2 = vsel %vm836_vm1, 1, %v3273_v1  ;;  %vm2294_vm2 = vcmp.eq.s32.totalorder %v299_v6, 1 }
  0x98   :  { %v698_v42 = vsub.s32 0, %v2278_v50  ;;  %v829_v53 = vshrl.u32 %v825_v57, 16  ;;  %v839_v21 = vadd.s32 %v837_v2, %v835_v33  ;;  %v559_v34 = vcvt.s32.f32 %v552_v31 }
  0x99   :  { %v914_v60 = vadd.s32 1, %v1703_v35  ;;  %v2303_v14 = vsel %vm441_vm12, %v563_v52, %v2062_v54  ;;  %vm697_vm3 = vcmp.lt.s32.totalorder %v2278_v50, 0  ;;  %v557_v59 = vand.u32 2147483647, %v556_v29 }
  0x9a   :  { %v807_v6 = vshrl.u32 %v2251_v62, 16  ;;  %v817_v17 = vadd.s32 %v815_v55, %v813_v16  ;;  %v765_v57 = vshrl.u32 %v3275_v37, %v2160_v12  ;;  %v786_v7 = vsel %vm784_vm8, %v2200_v4, 2102212464 }
  0x9b   :  { %vm915_vm4 = vcmp.gt.s32.totalorder %v914_v60, 0  ;;  %v3272_v26 = vand.u32 2147483647, %v2024_v46  ;;  %v3313_v54 = vperm.slane %v2158_v38, 1  ;;  %v3316_v62 = vperm.slane %v2158_v38, 2 }
  0x9c   :  { %v916_v31 = vsel %vm915_vm4, %v914_v60, 0  ;;  %v699_v12 = vsel %vm697_vm3, %v698_v42, %v2278_v50  ;;  %v831_v9 = vshrl.u32 %v2262_v18, 16  ;;  %v840_v4 = vadd.s32 %v839_v21, %v829_v53 }
  0x9d   :  { %vm2315_vm5 = vcmp.eq.s32.totalorder %v3313_v54, 1  ;;  %vm2321_vm6 = vcmp.eq.s32.totalorder %v3316_v62, 1  ;;  %v918_v16 = vand.u32 31, %v916_v31  ;;  %v3319_v33 = vperm.slane %v2158_v38, 3 }
  0x9e   :  { %v809_v42 = vshrl.u32 %v2256_v63, 16  ;;  %v818_v53 = vadd.s32 %v817_v17, %v807_v6  ;;  %v3322_v62 = vperm.slane %v2158_v38, 4  ;;  %v560_v30 = vmul.f32 %v559_v34, %v557_v59  ;;  %v2355_v63 = vpop.permute.xlu0 %314 }
  0x9f   :  { %vm2329_vm8 = vcmp.eq.s32.totalorder %v3319_v33, 1  ;;  %v2341_v21 = vsub.s32 32, %v918_v16  ;;  %v700_v2 = vclz %v699_v12  ;;  %v785_v60 = vsel %vm781_vm7, %v765_v57, %v2196_v58  ;;  %3325 = vst [vmem:[#allocation24_spill] sm:$0xff] %v2355_v63 }
  0xa0   :  { %vm2345_vm10 = vcmp.eq.s32.totalorder %v3322_v62, 1  ;;  %v787_v54 = vsel %vm783_vm9, %v2198_v48, %v786_v7  ;;  %v3326_v6 = vperm.slane %v2158_v38, 5  ;;  %v3329_v62 = vperm.slane %v2158_v38, 6 }
  0xa1   :  { %v3330_v34 = vmov 0  ;;  %v2369_v59 = vadd.s32 %v834_v24, %v830_v61  ;;  %v841_v58 = vadd.s32 %v840_v4, %v831_v9  ;;  %v911_v48 = vand.u32 8388607, %v3272_v26 }
  0xa2   :  { %vm2359_vm13 = vcmp.eq.s32.totalorder %v3326_v6, 1  ;;  %vm2365_vm14 = vcmp.eq.s32.totalorder %v3329_v62, 1  ;;  %v921_v57 = vshll.u32 %v3275_v37, %v918_v16  ;;  %v3333_v7 = vmov 2475754826  }
  0xa3   :  { %v3331_v34 = vsel %vm2365_vm14, 4294967295, %v3330_v34  ;;  %v922_v12 = vshrl.u32 %v3333_v7, %v2341_v21  ;;  %v924_v6 = vshll.u32 %v3333_v7, %v918_v16  ;;  %v3334_v18 = vmov 2131351028  }
  0xa4   :  { %3332 = vst [vmem:[#allocation25_spill] sm:$0xff] %v3331_v34  ;;  %v925_v38 = vshrl.u32 %v3334_v18, %v2341_v21  ;;  %v3335_v62 = vmov 2102212464   ;;  %v2380_v49 = vadd.s32 %v818_v53, %v809_v42  ;;  %v2382_v61 = vshrl.u32 %v916_v31, 5 }
  0xa5   :  { %v930_v55 = vshll.u32 %v3335_v62, %v918_v16  ;;  %v927_v24 = vshll.u32 %v3334_v18, %v918_v16  ;;  %v928_v9 = vshrl.u32 %v3335_v62, %v2341_v21  ;;  %v316_v4 = vsel %vm2294_vm2, %v2355_v63, 0 }
  0xa6   :  { %v561_v26 = vxor.u32 2147483648, %v560_v30  ;;  %v788_v28 = vsel %vm782_vm11, %v785_v60, %v787_v54  ;;  %v3336_v1 = vmov 920167782   ;;  %v1698_v42 = vadd.s32 4294967294, %v700_v2 }
  0xa7   :  { %v931_v37 = vshrl.u32 %v3336_v1, %v2341_v21  ;;  %v912_v53 = vor.u32 8388608, %v911_v48  ;;  %v933_v31 = vshll.u32 %v3336_v1, %v918_v16  ;;  %v3337_v19 = vmov 1326507024  }
  0xa8   :  { %v934_v43 = vshrl.u32 %v3337_v19, %v2341_v21  ;;  %v845_v3 = vadd.s32 1, %v841_v58  ;;  %v2397_v51 = vor.u32 %v922_v12, %v921_v57  ;;  %v2399_v40 = vor.u32 %v925_v38, %v924_v6 }
  0xa9   :  { %v932_v39 = vor.u32 %v931_v37, %v930_v55  ;;  %vm844_vm7 = vc.u32 %v2380_v49, %v2369_v59  ;;  %v2403_v23 = vor.u32 %v928_v9, %v927_v24  ;;  %vm936_vm9 = vcmp.lt.s32.totalorder %v2382_v61, 1 }
  0xaa   :  { %vm939_vm11 = vcmp.lt.s32.totalorder %v2382_v61, 4  ;;  %v317_v16 = vsel %vm2315_vm5, %v2355_v63, 0  ;;  %v318_v2 = vsel %vm2321_vm6, %v2355_v63, 0  ;;  %v562_v37 = vsel %vm441_vm12, %v561_v26, %v560_v30 }
  0xab   :  { %vm938_vm15 = vcmp.lt.s32.totalorder %v2382_v61, 3  ;;  %v319_v55 = vsel %vm2329_vm8, %v2355_v63, 0  ;;  %v842_v60 = vmul.u32 %v2209_v22, %v788_v28  ;;  %v935_v54 = vor.u32 %v934_v43, %v933_v31 }
  0xac   :  { %v945_v52 = vsel %vm939_vm11, %v932_v39, 920167782  ;;  %v846_v48 = vsel %vm844_vm7, %v845_v3, %v841_v58  ;;  %vm937_vm1 = vcmp.lt.s32.totalorder %v2382_v61, 2  ;;  %v944_v30 = vsel %vm936_vm9, %v2397_v51, %v2399_v40 }
  0xad   :  { %v2427_v26 = vshll.u32 %v912_v53, 8  ;;  %v320_v29 = vsel %vm2345_vm10, %v2355_v63, 0  ;;  %v2435_v22 = vsel %vm2282_vm0, %v1869_v13, %v562_v37  ;;  %vm1699_vm12 = vcmp.lt.s32.totalorder %v1698_v42, 0 }
  0xae   :  { %v946_v3 = vsel %vm938_vm15, %v2403_v23, %v945_v52  ;;  %v321_v43 = vsel %vm2359_vm13, %v2355_v63, 0  ;;  %v3338_v35 = vperm.slane %v2112_v0, 0  ;;  %v948_v58 = vsel %vm936_vm9, %v2399_v40, %v2403_v23 }
  0xaf   :  { %v2454_v57 = vadd.s32 %v846_v48, %v842_v60  ;;  %v947_v12 = vsel %vm937_vm1, %v944_v30, %v946_v3  ;;  %v949_v17 = vsel %vm939_vm11, %v935_v54, 1326507024  ;;  %v1062_v6 = vand.u32 2139095040, %v2026_v5 }
  0xb0   :  { %v2448_v33 = vshra.s32 %v316_v4, %v3338_v35  ;;  %v2463_v38 = vmul.f32 %v2435_v22, %v2435_v22  ;;  %v703_v24 = vsel %vm1699_vm12, 0, %v1698_v42  ;;  %v950_v9 = vsel %vm938_vm15, %v932_v39, %v949_v17 }
  0xb1   :  { %v953_v4 = vand.u32 65535, %v2427_v26  ;;  %v688_v53 = vadd.s32 %v2166_v10, %v2164_v44  ;;  %v704_v31 = vsub.s32 32, %v703_v24  ;;  %v951_v37 = vsel %vm937_vm1, %v948_v58, %v950_v9 }
  0xb2   :  { %v954_v60 = vshrl.u32 %v2427_v26, 16  ;;  %v3339_v54 = vperm.slane %v2112_v0, 1  ;;  %v955_v48 = vand.u32 65535, %v951_v37  ;;  %v956_v42 = vshrl.u32 %v951_v37, 16 }
  0xb3   :  { %v978_v30 = vshrl.u32 %v947_v12, 16  ;;  %v3340_v39 = vperm.slane %v2112_v0, 2  ;;  %v568_v35 = vmul.f32 -0.001358992, %v2463_v38  ;;  %v848_v44 = vadd.s32 536870912, %v2454_v57 }
  0xb4   :  { %v2475_v52 = vshra.s32 %v317_v16, %v3339_v54  ;;  %v1063_v10 = vshrl.u32 %v1062_v6, 23  ;;  %v575_v58 = vmul.f32 -0.00019511016, %v2463_v38  ;;  %v708_v17 = vsub.s32 4294967266, %v703_v24 }
  0xb5   :  { %v2479_v3 = vshra.s32 %v318_v2, %v3340_v39  ;;  %v958_v9 = vmul.u32 %v956_v42, %v953_v4  ;;  %v977_v28 = vand.u32 65535, %v947_v12  ;;  %v3341_v16 = vperm.slane %v2112_v0, 3 }
  0xb6   :  { %v705_v37 = vshll.u32 %v2278_v50, %v703_v24  ;;  %v706_v63 = vshrl.u32 %v688_v53, %v704_v31  ;;  %v959_v34 = vmul.u32 %v955_v48, %v954_v60  ;;  %v3342_v2 = vperm.slane %v2112_v0, 4 }
  0xb7   :  { %v2486_v54 = vshra.s32 %v319_v55, %v3341_v16  ;;  %v3344_v11 = vperm.slane %v2112_v0, 5  ;;  %v957_v41 = vmul.u32 %v955_v48, %v953_v4  ;;  %v980_v27 = vmul.u32 %v978_v30, %v953_v4 }
  0xb8   :  { %v2491_v39 = vshra.s32 %v320_v29, %v3342_v2  ;;  %v569_v20 = vadd.f32 0.041655596, %v568_v35  ;;  %v2497_v12 = vshrl.u32 %v848_v44, 30  ;;  %v961_v56 = vshll.u32 %v958_v9, 16 }
  0xb9   :  { %v2495_v6 = vshra.s32 %v321_v43, %v3344_v11  ;;  %v1706_v55 = vadd.s32 4294967169, %v1063_v10  ;;  %v576_v16 = vadd.f32 0.008332121, %v575_v58  ;;  %v709_v46 = vadd.s32 127, %v708_v17 }
  0xba   :  { %3343 = vst [vmem:[#allocation26_spill] sm:$0xff] %v2491_v39  ;;  %v960_v50 = vmul.u32 %v956_v42, %v954_v60  ;;  %v981_v24 = vmul.u32 %v977_v28, %v954_v60  ;;  %v2499_v53 = vor.u32 %v706_v63, %v705_v37  ;;  %v3346_v29 = vmov 683565275  }
  0xbb   :  { %3345 = vst [vmem:[#allocation27_spill] sm:$0xff] %v2495_v6  ;;  %v920_v31 = vshrl.u32 %v3346_v29, %v2341_v21  ;;  %v963_v2 = vshll.u32 %v959_v34, 16  ;;  %v979_v0 = vmul.u32 %v977_v28, %v953_v4  ;;  %v941_v11 = vsel %vm939_vm11, %v2403_v23, 2102212464 }
  0xbc   :  { %vm965_vm2 = vc.u32 %v957_v41, %v961_v56  ;;  %v967_v43 = vadd.s32 %v961_v56, %v957_v41  ;;  %v983_v48 = vshll.u32 %v980_v27, 16  ;;  %v850_v35 = vshll.u32 %v2497_v12, 30 }
  0xbd   :  { %v3347_v44 = vmov 0   ;;  %v982_v42 = vmul.u32 %v978_v30, %v954_v60  ;;  %v1069_v58 = vadd.s32 1, %v1706_v55  ;;  %v962_v63 = vshrl.u32 %v958_v9, 16 }
  0xbe   :  { %v966_v10 = vsel %vm965_vm2, 1, %v3347_v44  ;;  %vm969_vm3 = vc.u32 %v967_v43, %v963_v2  ;;  %v985_v37 = vshll.u32 %v981_v24, 16  ;;  %v940_v21 = vsel %vm936_vm9, %v920_v31, %v2397_v51 }
  0xbf   :  { %v968_v17 = vadd.s32 %v966_v10, %v960_v50  ;;  %v942_v23 = vsel %vm938_vm15, %v2399_v40, %v941_v11  ;;  %v970_v56 = vsel %vm969_vm3, 1, %v3347_v44  ;;  %vm987_vm4 = vc.u32 %v979_v0, %v983_v48 }
  0xc0   :  { %v964_v41 = vshrl.u32 %v959_v34, 16  ;;  %v988_v4 = vsel %vm987_vm4, 1, %v3347_v44  ;;  %v989_v60 = vadd.s32 %v983_v48, %v979_v0  ;;  %v710_v30 = vshll.u32 %v709_v46, 23 }
  0xc1   :  { %v972_v28 = vadd.s32 %v970_v56, %v968_v17  ;;  %v990_v9 = vadd.s32 %v988_v4, %v982_v42  ;;  %v3288_v55 = vand.u32 2147483647, %v2026_v5  ;;  %vm1070_vm5 = vcmp.gt.s32.totalorder %v1069_v58, 0 }
  0xc2   :  { %v984_v2 = vshrl.u32 %v980_v27, 16  ;;  %vm991_vm6 = vc.u32 %v989_v60, %v985_v37  ;;  %v1071_v51 = vsel %vm1070_vm5, %v1069_v58, 0  ;;  %v2518_v31 = vsub.s32 %v2454_v57, %v850_v35 }
  0xc3   :  { %v973_v50 = vadd.s32 %v972_v28, %v962_v63  ;;  %v943_v40 = vsel %vm937_vm1, %v940_v21, %v942_v23  ;;  %v992_v34 = vsel %vm991_vm6, 1, %v3347_v44  ;;  %v1073_v11 = vand.u32 31, %v1071_v51 }
  0xc4   :  { %v986_v46 = vshrl.u32 %v981_v24, 16  ;;  %v2525_v0 = vadd.s32 %v989_v60, %v985_v37  ;;  %v994_v48 = vadd.s32 %v992_v34, %v990_v9  ;;  %v337_v10 = vand.u32 1, %v2448_v33 }
  0xc5   :  { %v2523_v43 = vadd.s32 %v973_v50, %v964_v41  ;;  %v570_v42 = vmul.f32 %v569_v20, %v2463_v38  ;;  %v2530_v57 = vsub.s32 32, %v1073_v11  ;;  %v577_v61 = vmul.f32 %v576_v16, %v2463_v38 }
  0xc6   :  { %v711_v35 = vor.u32 4788187, %v710_v30  ;;  %v714_v58 = vcvt.s32.f32 %v2499_v53  ;;  %v995_v63 = vadd.s32 %v994_v48, %v984_v2  ;;  %vm852_vm8 = vcmp.lt.s32.totalorder %v2518_v31, 0 }
  0xc7   :  { %v853_v24 = vsub.s32 0, %v2518_v31  ;;  %v997_v17 = vmul.u32 %v2427_v26, %v943_v40  ;;  %v1066_v37 = vand.u32 8388607, %v3288_v55  ;;  %vm999_vm10 = vc.u32 %v2523_v43, %v2525_v0 }
  0xc8   :  { %v996_v21 = vadd.s32 %v995_v63, %v986_v46  ;;  %v1079_v20 = vshll.u32 %v3333_v7, %v1073_v11  ;;  %v1085_v16 = vshll.u32 %v3335_v62, %v1073_v11  ;;  %v1080_v53 = vshrl.u32 %v3334_v18, %v2530_v57 }
  0xc9   :  { %v1082_v23 = vshll.u32 %v3334_v18, %v1073_v11  ;;  %v1083_v56 = vshrl.u32 %v3335_v62, %v2530_v57  ;;  %v1086_v26 = vshrl.u32 %v3336_v1, %v2530_v57  ;;  %v2550_v28 = vshrl.u32 %v1071_v51, 5 }
  0xca   :  { %v1000_v41 = vadd.s32 1, %v996_v21  ;;  %v1088_v4 = vshll.u32 %v3336_v1, %v1073_v11  ;;  %v1089_v60 = vshrl.u32 %v3337_v19, %v2530_v57  ;;  %v712_v30 = vand.u32 2147483647, %v711_v35 }
  0xcb   :  { %v1067_v9 = vor.u32 8388608, %v1066_v37  ;;  %v1076_v50 = vshll.u32 %v3346_v29, %v1073_v11  ;;  %v1077_v2 = vshrl.u32 %v3333_v7, %v2530_v57  ;;  %vm596_vm13 = vcmp.lt.s32.totalorder %v1965_v8, 0 }
  0xcc   :  { %v854_v40 = vsel %vm852_vm8, %v853_v24, %v2518_v31  ;;  %v1001_v51 = vsel %vm999_vm10, %v1000_v41, %v996_v21  ;;  %v1087_v34 = vor.u32 %v1086_v26, %v1085_v16  ;;  %v1090_v46 = vor.u32 %v1089_v60, %v1088_v4 }
  0xcd   :  { %v339_v48 = vand.u32 1, %v2479_v3  ;;  %v1002_v35 = vadd.s32 %v1001_v51, %v997_v17  ;;  %v2566_v63 = vor.u32 %v1080_v53, %v1079_v20  ;;  %v2568_v11 = vor.u32 %v1083_v56, %v1082_v23 }
  0xce   :  { %v571_v37 = vadd.f32 -0.4999988, %v570_v42  ;;  %v578_v55 = vadd.f32 -0.16666654, %v577_v61  ;;  %vm1091_vm7 = vcmp.lt.s32.totalorder %v2550_v28, 1  ;;  %vm1094_vm9 = vcmp.lt.s32.totalorder %v2550_v28, 4 }
  0xcf   :  { %v3348_v24 = vand.u32 2147483647, %v1965_v8  ;;  %v715_v21 = vmul.f32 %v714_v58, %v712_v30  ;;  %v855_v16 = vclz %v854_v40  ;;  %v2578_v3 = vor.u32 %v1077_v2, %v1076_v50 }
  0xd0   :  { %vm1093_vm15 = vcmp.lt.s32.totalorder %v2550_v28, 3  ;;  %v1003_v17 = vadd.s32 536870912, %v1002_v35  ;;  %v1100_v42 = vsel %vm1094_vm9, %v1087_v34, 920167782  ;;  %v1104_v61 = vsel %vm1094_vm9, %v1090_v46, 1326507024 }
  0xd1   :  { %vm2574_vm11 = vcmp.le.f32.partialorder %v3348_v24, 0.7853982  ;;  %v2585_v20 = vshll.u32 %v1067_v9, 8  ;;  %v340_v53 = vand.u32 1, %v2486_v54  ;;  %vm1092_vm1 = vcmp.lt.s32.totalorder %v2550_v28, 2 }
  0xd2   :  { %v1103_v58 = vsel %vm1091_vm7, %v2566_v63, %v2568_v11  ;;  %v572_v26 = vmul.f32 %v571_v37, %v2463_v38  ;;  %v579_v41 = vmul.f32 %v578_v55, %v2463_v38  ;;  %v1105_v4 = vsel %vm1093_vm15, %v1087_v34, %v1104_v61 }
  0xd3   :  { %v716_v60 = vxor.u32 2147483648, %v715_v21  ;;  %v1701_v54 = vadd.s32 4294967294, %v855_v16  ;;  %v1099_v30 = vsel %vm1091_vm7, %v2578_v3, %v2566_v63  ;;  %v1101_v9 = vsel %vm1093_vm15, %v2568_v11, %v1100_v42 }
  0xd4   :  { %v2606_v50 = vshrl.u32 %v1003_v17, 30  ;;  %v1106_v2 = vsel %vm1092_vm1, %v1103_v58, %v1105_v4  ;;  %v1108_v38 = vand.u32 65535, %v2585_v20  ;;  %v1109_v55 = vshrl.u32 %v2585_v20, 16 }
  0xd5   :  { %v3351_v40 = vperm.slane %v2080_v15, 0  ;;  %v3352_v34 = vand.u32 1, %v2475_v52  ;;  %v3353_v46 = vperm.slane %v2080_v15, 1  ;;  %v3354_v24 = vperm.slane %v2080_v15, 2 }
  0xd6   :  { %v3355_v17 = vperm.slane %v2080_v15, 3  ;;  %v3356_v33 = vsel %vm2282_vm0, 0, %v2303_v14  ;;  %v1102_v52 = vsel %vm1092_vm1, %v1099_v30, %v1101_v9  ;;  %v1110_v61 = vand.u32 65535, %v1106_v2 }
  0xd7   :  { %v2616_v51 = vxor.u32 %v3351_v40, %v337_v10  ;;  %v2622_v37 = vxor.u32 %v3353_v46, %v3352_v34  ;;  %v2626_v16 = vxor.u32 %v3354_v24, %v339_v48  ;;  %v583_v10 = vadd.s32 3, %v3356_v33 }
  0xd8   :  { %v2630_v42 = vxor.u32 %v3355_v17, %v340_v53  ;;  %v1111_v58 = vshrl.u32 %v1106_v2, 16  ;;  %v2638_v4 = vadd.f32 1.0, %v572_v26  ;;  %v580_v40 = vadd.f32 1.0, %v579_v41 }
  0xd9   :  { %v717_v48 = vsel %vm596_vm13, %v716_v60, %v715_v21  ;;  %vm1702_vm12 = vcmp.lt.s32.totalorder %v1701_v54, 0  ;;  %v1005_v53 = vshll.u32 %v2606_v50, 30  ;;  %v1112_v34 = vmul.u32 %v1110_v61, %v1108_v38 }
  0xda   :  { %v1113_v46 = vmul.u32 %v1111_v58, %v1108_v38  ;;  %v2643_v32 = vmul.u32 %v1110_v61, %v1109_v55  ;;  %v1133_v9 = vshrl.u32 %v1102_v52, 16  ;;  %v2651_v26 = vsel %vm2574_vm11, %v1965_v8, %v717_v48 }
  0xdb   :  { %v1115_v21 = vmul.u32 %v1111_v58, %v1109_v55  ;;  %v2655_v2 = vmul.f32 %v580_v40, %v2435_v22  ;;  %v2657_v17 = vand.u32 3, %v583_v10  ;;  %v2659_v33 = vsel %vm1702_vm12, 0, %v1701_v54 }
  0xdc   :  { %v1116_v41 = vshll.u32 %v1113_v46, 16  ;;  %v1118_v60 = vshll.u32 %v2643_v32, 16  ;;  %v1132_v61 = vand.u32 65535, %v1102_v52  ;;  %v590_v23 = vxor.u32 2147483648, %v2638_v4 }
  0xdd   :  { %v2662_v56 = vsub.s32 %v1002_v35, %v1005_v53  ;;  %v2666_v58 = vmul.f32 %v2651_v26, %v2651_v26  ;;  %v843_v48 = vadd.s32 %v2369_v59, %v2380_v49  ;;  %v1135_v10 = vmul.u32 %v1133_v9, %v1108_v38 }
  0xde   :  { %vm1120_vm0 = vc.u32 %v1112_v34, %v1116_v41  ;;  %v1122_v30 = vadd.s32 %v1116_v41, %v1112_v34  ;;  %v859_v54 = vsub.s32 32, %v2659_v33  ;;  %v863_v52 = vsub.s32 4294967266, %v2659_v33 }
  0xdf   :  { %v1121_v22 = vsel %vm1120_vm0, 1, %v3347_v44  ;;  %vm589_vm3 = vcmp.eq.s32.totalorder %v2657_v17, 2  ;;  %v718_v35 = vsub.s32 4, %v2254_v36  ;;  %v1134_v34 = vmul.u32 %v1132_v61, %v1108_v38 }
  0xe0   :  { %v1123_v40 = vadd.s32 %v1121_v22, %v1115_v21  ;;  %vm1124_vm2 = vc.u32 %v1122_v30, %v1118_v60  ;;  %v1136_v41 = vmul.u32 %v1132_v61, %v1109_v55  ;;  %v723_v24 = vmul.f32 -0.001358992, %v2666_v58 }
  0xe1   :  { %v1125_v53 = vsel %vm1124_vm2, 1, %v3347_v44  ;;  %v1008_v49 = vsub.s32 0, %v2662_v56  ;;  %v1117_v59 = vshrl.u32 %v1113_v46, 16  ;;  %vm1007_vm4 = vcmp.lt.s32.totalorder %v2662_v56, 0 }
  0xe2   :  { %v1127_v14 = vadd.s32 %v1125_v53, %v1123_v40  ;;  %v1137_v39 = vmul.u32 %v1133_v9, %v1109_v55  ;;  %v1138_v15 = vshll.u32 %v1135_v10, 16  ;;  %v1217_v30 = vand.u32 2139095040, %v2030_v45 }
  0xe3   :  { %v860_v21 = vshll.u32 %v2518_v31, %v2659_v33  ;;  %v861_v60 = vshrl.u32 %v843_v48, %v859_v54  ;;  %v864_v22 = vadd.s32 127, %v863_v52  ;;  %v1075_v38 = vshrl.u32 %v3346_v29, %v2530_v57 }
  0xe4   :  { %v1096_v61 = vsel %vm1094_vm9, %v2568_v11, 2102212464  ;;  %v1140_v46 = vshll.u32 %v1136_v41, 16  ;;  %vm1142_vm5 = vc.u32 %v1134_v34, %v1138_v15  ;;  %v1144_v40 = vadd.s32 %v1138_v15, %v1134_v34 }
  0xe5   :  { %v1009_v55 = vsel %vm1007_vm4, %v1008_v49, %v2662_v56  ;;  %v1119_v9 = vshrl.u32 %v2643_v32, 16  ;;  %v1128_v53 = vadd.s32 %v1127_v14, %v1117_v59  ;;  %v1143_v6 = vsel %vm1142_vm5, 1, %v3347_v44 }
  0xe6   :  { %v1139_v31 = vshrl.u32 %v1135_v10, 16  ;;  %v1145_v33 = vadd.s32 %v1143_v6, %v1137_v39  ;;  %vm1146_vm6 = vc.u32 %v1144_v40, %v1140_v46  ;;  %v1218_v48 = vshrl.u32 %v1217_v30, 23 }
  0xe7   :  { %vm585_vm8 = vcmp.lt.s32.totalorder %v2657_v17, 2  ;;  %v865_v57 = vshll.u32 %v864_v22, 23  ;;  %v1095_v11 = vsel %vm1091_vm7, %v1075_v38, %v2578_v3  ;;  %v1097_v15 = vsel %vm1093_vm15, %v2566_v63, %v1096_v61 }
  0xe8   :  { %v1147_v32 = vsel %vm1146_vm6, 1, %v3347_v44  ;;  %v1010_v14 = vclz %v1009_v55  ;;  %v1141_v54 = vshrl.u32 %v1136_v41, 16  ;;  %v1709_v10 = vadd.s32 4294967169, %v1218_v48 }
  0xe9   :  { %v1149_v52 = vadd.s32 %v1147_v32, %v1145_v33  ;;  %vm586_vm10 = vcmp.eq.s32.totalorder %v2657_v17, 0  ;;  %v730_v39 = vmul.f32 -0.00019511016, %v2666_v58  ;;  %v2700_v6 = vadd.s32 %v1128_v53, %v1119_v9 }
  0xea   :  { %v2702_v34 = vadd.s32 %v1144_v40, %v1140_v46  ;;  %v724_v49 = vadd.f32 0.041655596, %v723_v24  ;;  %v1098_v3 = vsel %vm1092_vm1, %v1095_v11, %v1097_v15  ;;  %v1224_v63 = vadd.s32 1, %v1709_v10 }
  0xeb   :  { %v1150_v59 = vadd.s32 %v1149_v52, %v1139_v31  ;;  %v587_v30 = vxor.u32 2147483648, %v2655_v2  ;;  %v591_v41 = vsel %vm589_vm3, %v590_v23, %v2655_v2  ;;  %v862_v22 = vor.u32 %v861_v60, %v860_v21 }
  0xec   :  { %v866_v38 = vor.u32 4788187, %v865_v57  ;;  %v719_v61 = vsel %vm596_vm13, %v718_v35, %v2254_v36  ;;  %v1704_v46 = vadd.s32 4294967294, %v1010_v14  ;;  %vm1225_vm7 = vcmp.gt.s32.totalorder %v1224_v63, 0 }
  0xed   :  { %v1151_v40 = vadd.s32 %v1150_v59, %v1141_v54  ;;  %v731_v24 = vadd.f32 0.008332121, %v730_v39  ;;  %v1152_v28 = vmul.u32 %v2585_v20, %v1098_v3  ;;  %vm1154_vm9 = vc.u32 %v2700_v6, %v2702_v34 }
  0xee   :  { %v1226_v55 = vsel %vm1225_vm7, %v1224_v63, 0  ;;  %v725_v9 = vmul.f32 %v724_v49, %v2666_v58  ;;  %v3293_v23 = vand.u32 2147483647, %v2030_v45  ;;  %v588_v36 = vsel %vm586_vm10, %v2638_v4, %v587_v30 }
  0xef   :  { %v1155_v53 = vadd.s32 1, %v1151_v40  ;;  %v1228_v2 = vand.u32 31, %v1226_v55  ;;  %v721_v35 = vsel %vm2574_vm11, 0, %v719_v61  ;;  %v867_v21 = vand.u32 2147483647, %v866_v38 }
  0xf0   :  { %v869_v60 = vcvt.s32.f32 %v862_v22  ;;  %v361_v20 = vcvt.s32.f32 %v2630_v42  ;;  %vm1705_vm13 = vcmp.lt.s32.totalorder %v1704_v46, 0  ;;  %v3357_v48 = vcvt.s32.f32 %v2616_v51 }
  0xf1   :  { %v1156_v31 = vsel %vm1154_vm9, %v1155_v53, %v1151_v40  ;;  %v2724_v33 = vsub.s32 32, %v1228_v2  ;;  %v3358_v11 = vcvt.s32.f32 %v2622_v37  ;;  %v732_v4 = vmul.f32 %v731_v24, %v2666_v58 }
  0xf2   :  { %v2728_v57 = vmul.f32 0.1, %v3357_v48  ;;  %v1157_v27 = vadd.s32 %v1156_v31, %v1152_v28  ;;  %v2737_v32 = vsel %vm585_vm8, %v588_v36, %v591_v41  ;;  %v2739_v14 = vadd.f32 -0.4999988, %v725_v9 }
  0xf3   :  { %v2732_v15 = vmul.f32 0.1, %v3358_v11  ;;  %v2741_v54 = vadd.s32 3, %v721_v35  ;;  %vm751_vm11 = vcmp.lt.s32.totalorder %v2020_v25, 0  ;;  %v1221_v51 = vand.u32 8388607, %v3293_v23 }
  0xf4   :  { %v870_v52 = vmul.f32 %v869_v60, %v867_v21  ;;  %v2746_v37 = vsel %vm1705_vm13, 0, %v1704_v46  ;;  %v1158_v10 = vadd.s32 536870912, %v1157_v27  ;;  %v1234_v39 = vshll.u32 %v3333_v7, %v1228_v2  ;;  %v3366_v23 = vld [vmem:[#allocation13_spill] sm:$0xff] }
  0xf5   :  { %3359 = vst [vmem:[#allocation28_spill] sm:$0xff] %v2732_v15  ;;  %v1235_v17 = vshrl.u32 %v3334_v18, %v2724_v33  ;;  %v1237_v49 = vshll.u32 %v3334_v18, %v1228_v2  ;;  %v1238_v3 = vshrl.u32 %v3335_v62, %v2724_v33  ;;  %v1240_v59 = vshll.u32 %v3335_v62, %v1228_v2 }
  0xf6   :  { %v733_v63 = vadd.f32 -0.16666654, %v732_v4  ;;  %v2755_v30 = vshrl.u32 %v1158_v10, 30  ;;  %v2757_v41 = vshrl.u32 %v1226_v55, 5  ;;  %v1241_v22 = vshrl.u32 %v3336_v1, %v2724_v33 }
  0xf7   :  { %v1018_v38 = vsub.s32 4294967266, %v2746_v37  ;;  %v1222_v61 = vor.u32 8388608, %v1221_v51  ;;  %v1243_v46 = vshll.u32 %v3336_v1, %v1228_v2  ;;  %v1244_v40 = vshrl.u32 %v3337_v19, %v2724_v33 }
  0xf8   :  { %vm582_vm15 = vweird.f32 %v1869_v13  ;;  %v871_v24 = vxor.u32 2147483648, %v870_v52  ;;  %v1160_v28 = vshll.u32 %v2755_v30, 30  ;;  %v1231_v9 = vshll.u32 %v3346_v29, %v1228_v2 }
  0xf9   :  { %v1232_v55 = vshrl.u32 %v3333_v7, %v2724_v33  ;;  %v3360_v53 = vand.u32 2147483647, %v2020_v25  ;;  %v2776_v35 = vor.u32 %v1235_v17, %v1234_v39  ;;  %v2778_v21 = vor.u32 %v1238_v3, %v1237_v49 }
  0xfa   :  { %v1242_v60 = vor.u32 %v1241_v22, %v1240_v59  ;;  %v1245_v31 = vor.u32 %v1244_v40, %v1243_v46  ;;  %v998_v48 = vadd.s32 %v2525_v0, %v2523_v43  ;;  %v1014_v2 = vsub.s32 32, %v2746_v37 }
  0xfb   :  { %vm2772_vm1 = vcmp.le.f32.partialorder %v3360_v53, 0.7853982  ;;  %v2783_v11 = vsub.s32 %v1157_v27, %v1160_v28  ;;  %vm1246_vm12 = vcmp.lt.s32.totalorder %v2757_v41, 1  ;;  %v1019_v4 = vadd.s32 127, %v1018_v38 }
  0xfc   :  { %vm1249_vm0 = vcmp.lt.s32.totalorder %v2757_v41, 4  ;;  %v2787_v51 = vshll.u32 %v1222_v61, 8  ;;  %v1372_v10 = vand.u32 2139095040, %v2032_v47  ;;  %v2792_v17 = vor.u32 %v1232_v55, %v1231_v9 }
  0xfd   :  { %vm1162_vm2 = vcmp.lt.s32.totalorder %v2783_v11, 0  ;;  %v1163_v39 = vsub.s32 0, %v2783_v11  ;;  %vm1248_vm3 = vcmp.lt.s32.totalorder %v2757_v41, 3  ;;  %vm1247_vm4 = vcmp.lt.s32.totalorder %v2757_v41, 2 }
  0xfe   :  { %v1255_v43 = vsel %vm1249_vm0, %v1242_v60, 920167782  ;;  %v1258_v0 = vsel %vm1246_vm12, %v2776_v35, %v2778_v21  ;;  %v1259_v27 = vsel %vm1249_vm0, %v1245_v31, 1326507024  ;;  %v872_v49 = vsel %vm751_vm11, %v871_v24, %v870_v52 }
  0xff   :  { %v1015_v3 = vshll.u32 %v2662_v56, %v2746_v37  ;;  %v1016_v59 = vshrl.u32 %v998_v48, %v1014_v2  ;;  %v1164_v22 = vsel %vm1162_vm2, %v1163_v39, %v2783_v11  ;;  %v1020_v38 = vshll.u32 %v1019_v4, 23 }
 0x100   :  { %v1165_v61 = vclz %v1164_v22  ;;  %v1260_v46 = vsel %vm1248_vm3, %v1242_v60, %v1259_v27  ;;  %v1263_v40 = vand.u32 65535, %v2787_v51  ;;  %v1254_v28 = vsel %vm1246_vm12, %v2792_v17, %v2776_v35 }
 0x101   :  { %v1256_v52 = vsel %vm1248_vm3, %v2778_v21, %v1255_v43  ;;  %v1261_v56 = vsel %vm1247_vm4, %v1258_v0, %v1260_v46  ;;  %v1264_v37 = vshrl.u32 %v2787_v51, 16  ;;  %v1373_v53 = vshrl.u32 %v1372_v10, 23 }
 0x102   :  { %v1707_v24 = vadd.s32 4294967294, %v1165_v61  ;;  %v1265_v9 = vand.u32 65535, %v1261_v56  ;;  %v1266_v55 = vshrl.u32 %v1261_v56, 16  ;;  %v3363_v60 = vcvt.s32.f32 %v2626_v16 }
 0x103   :  { %v2828_v48 = vmul.f32 0.1, %v361_v20  ;;  %v727_v2 = vmul.f32 %v2739_v14, %v2666_v58  ;;  %v873_v4 = vsub.s32 4, %v2497_v12  ;;  %v2836_v39 = vsel %vm582_vm15, nan, %v2737_v32 }
 0x104   :  { %v2824_v31 = vmul.f32 0.1, %v3363_v60  ;;  %v1017_v43 = vor.u32 %v1016_v59, %v1015_v3  ;;  %v1257_v16 = vsel %vm1247_vm4, %v1254_v28, %v1256_v52  ;;  %v1268_v10 = vmul.u32 %v1266_v55, %v1263_v40 }
 0x105   :  { %3365 = vst [vmem:[#allocation30_spill] sm:$0xff] %v2828_v48  ;;  %v2841_v0 = vand.u32 3, %v2741_v54  ;;  %v2846_v42 = vsel %vm2772_vm1, %v2020_v25, %v872_v49  ;;  %v1021_v20 = vor.u32 4788187, %v1020_v38  ;;  %v1269_v14 = vmul.u32 %v1265_v9, %v1264_v37 }
 0x106   :  { %3364 = vst [vmem:[#allocation29_spill] sm:$0xff] %v2824_v31  ;;  %v2849_v27 = vmul.f32 %v733_v63, %v2666_v58  ;;  %vm1708_vm5 = vcmp.lt.s32.totalorder %v1707_v24, 0  ;;  %v1267_v13 = vmul.u32 %v1265_v9, %v1263_v40  ;;  %v1712_v32 = vadd.s32 4294967169, %v1373_v53 }
 0x107   :  { %v2851_v3 = vadd.f32 1.0, %v727_v2  ;;  %v2856_v54 = vsel %vm751_vm11, %v873_v4, %v2497_v12  ;;  %v1287_v59 = vand.u32 65535, %v1257_v16  ;;  %v1288_v22 = vshrl.u32 %v1257_v16, 16 }
 0x108   :  { %v2860_v49 = vmul.f32 %v2846_v42, %v2846_v42  ;;  %v1024_v38 = vcvt.s32.f32 %v1017_v43  ;;  %v1270_v61 = vmul.u32 %v1266_v55, %v1264_v37  ;;  %v1271_v58 = vshll.u32 %v1268_v10, 16 }
 0x109   :  { %v1022_v63 = vand.u32 2147483647, %v1021_v20  ;;  %v1153_v46 = vadd.s32 %v2702_v34, %v2700_v6  ;;  %v2864_v28 = vsel %vm1708_vm5, 0, %v1707_v24  ;;  %v1273_v52 = vshll.u32 %v1269_v14, 16 }
 0x10a   :  { %vm1275_vm6 = vc.u32 %v1267_v13, %v1271_v58  ;;  %v1277_v56 = vadd.s32 %v1271_v58, %v1267_v13  ;;  %v3294_v12 = vand.u32 2147483647, %v2032_v47  ;;  %v1379_v9 = vadd.s32 1, %v1712_v32 }
 0x10b   :  { %v1276_v53 = vsel %vm1275_vm6, 1, %v3347_v44  ;;  %v1289_v60 = vmul.u32 %v1287_v59, %v1263_v40  ;;  %v1290_v2 = vmul.u32 %v1288_v22, %v1263_v40  ;;  %v1291_v4 = vmul.u32 %v1287_v59, %v1264_v37 }
 0x10c   :  { %v1173_v55 = vsub.s32 4294967266, %v2864_v28  ;;  %v1272_v43 = vshrl.u32 %v1268_v10, 16  ;;  %v1278_v16 = vadd.s32 %v1276_v53, %v1270_v61  ;;  %vm1279_vm8 = vc.u32 %v1277_v56, %v1273_v52 }
 0x10d   :  { %v1280_v6 = vsel %vm1279_vm8, 1, %v3347_v44  ;;  %v1292_v34 = vmul.u32 %v1288_v22, %v1264_v37  ;;  %v1293_v24 = vshll.u32 %v1290_v2, 16  ;;  %v1295_v20 = vshll.u32 %v1291_v4, 16 }
 0x10e   :  { %vm906_vm10 = vcmp.lt.s32.totalorder %v3366_v23, 0  ;;  %v1025_v13 = vmul.f32 %v1024_v38, %v1022_v63  ;;  %v1230_v32 = vshrl.u32 %v3346_v29, %v2724_v33  ;;  %v1282_v58 = vadd.s32 %v1280_v6, %v1278_v16 }
 0x10f   :  { %v2875_v40 = vand.u32 8388607, %v3294_v12  ;;  %v1251_v10 = vsel %vm1249_vm0, %v2778_v21, 2102212464  ;;  %vm1297_vm7 = vc.u32 %v1289_v60, %v1293_v24  ;;  %v1299_v59 = vadd.s32 %v1293_v24, %v1289_v60 }
 0x110   :  { %vm1380_vm9 = vcmp.gt.s32.totalorder %v1379_v9, 0  ;;  %v1274_v37 = vshrl.u32 %v1269_v14, 16  ;;  %v1283_v22 = vadd.s32 %v1282_v58, %v1272_v43  ;;  %v1298_v61 = vsel %vm1297_vm7, 1, %v3347_v44 }
 0x111   :  { %v1381_v38 = vsel %vm1380_vm9, %v1379_v9, 0  ;;  %v1174_v63 = vadd.s32 127, %v1173_v55  ;;  %v1294_v52 = vshrl.u32 %v1290_v2, 16  ;;  %v1300_v33 = vadd.s32 %v1298_v61, %v1292_v34 }
 0x112   :  { %vm1301_vm13 = vc.u32 %v1299_v59, %v1295_v20  ;;  %v3367_v56 = vand.u32 2147483647, %v3366_v23  ;;  %v1250_v21 = vsel %vm1246_vm12, %v1230_v32, %v2792_v17  ;;  %v1252_v14 = vsel %vm1248_vm3, %v2776_v35, %v1251_v10 }
 0x113   :  { %v1302_v9 = vsel %vm1301_vm13, 1, %v3347_v44  ;;  %v1383_v60 = vand.u32 31, %v1381_v38  ;;  %v1026_v2 = vxor.u32 2147483648, %v1025_v13  ;;  %v1169_v55 = vsub.s32 32, %v2864_v28 }
 0x114   :  { %vm2883_vm11 = vcmp.le.f32.partialorder %v3367_v56, 0.7853982  ;;  %v1296_v43 = vshrl.u32 %v1291_v4, 16  ;;  %v1304_v16 = vadd.s32 %v1302_v9, %v1300_v33  ;;  %v2895_v6 = vadd.s32 %v1283_v22, %v1274_v37 }
 0x115   :  { %v2897_v34 = vadd.s32 %v1299_v59, %v1295_v20  ;;  %v1377_v24 = vor.u32 8388608, %v2875_v40  ;;  %v2900_v58 = vsub.s32 32, %v1383_v60  ;;  %v1170_v17 = vshll.u32 %v2783_v11, %v2864_v28 }
 0x116   :  { %v1175_v35 = vshll.u32 %v1174_v63, 23  ;;  %v1253_v32 = vsel %vm1247_vm4, %v1250_v21, %v1252_v14  ;;  %v1305_v10 = vadd.s32 %v1304_v16, %v1294_v52  ;;  %v1386_v61 = vshll.u32 %v3346_v29, %v1383_v60 }
 0x117   :  { %v1387_v4 = vshrl.u32 %v3333_v7, %v2900_v58  ;;  %v1389_v20 = vshll.u32 %v3333_v7, %v1383_v60  ;;  %v1390_v40 = vshrl.u32 %v3334_v18, %v2900_v58  ;;  %v1171_v59 = vshrl.u32 %v1153_v46, %v1169_v55 }
 0x118   :  { %v1306_v37 = vadd.s32 %v1305_v10, %v1296_v43  ;;  %v2912_v22 = vshrl.u32 %v1381_v38, 5  ;;  %v1395_v11 = vshll.u32 %v3335_v62, %v1383_v60  ;;  %v1307_v41 = vmul.u32 %v2787_v51, %v1253_v32 }
 0x119   :  { %vm1309_vm15 = vc.u32 %v2895_v6, %v2897_v34  ;;  %v1392_v28 = vshll.u32 %v3334_v18, %v1383_v60  ;;  %v1393_v63 = vshrl.u32 %v3335_v62, %v2900_v58  ;;  %v1027_v7 = vsel %vm906_vm10, %v1026_v2, %v1025_v13 }
 0x11a   :  { %v1310_v52 = vadd.s32 1, %v1306_v37  ;;  %v1396_v46 = vshrl.u32 %v3336_v1, %v2900_v58  ;;  %v1398_v38 = vshll.u32 %v3336_v1, %v1383_v60  ;;  %v1176_v33 = vor.u32 4788187, %v1175_v35 }
 0x11b   :  { %v2926_v56 = vor.u32 %v1387_v4, %v1386_v61  ;;  %v2928_v51 = vor.u32 %v1390_v40, %v1389_v20  ;;  %v1399_v18 = vshrl.u32 %v3337_v19, %v2900_v58  ;;  %v1172_v21 = vor.u32 %v1171_v59, %v1170_v17 }
 0x11c   :  { %v1311_v14 = vsel %vm1309_vm15, %v1310_v52, %v1306_v37  ;;  %v1397_v62 = vor.u32 %v1396_v46, %v1395_v11  ;;  %vm1401_vm12 = vcmp.lt.s32.totalorder %v2912_v22, 1  ;;  %v735_v13 = vadd.f32 1.0, %v2849_v27 }
 0x11d   :  { %v1312_v9 = vadd.s32 %v1311_v14, %v1307_v41  ;;  %v2934_v2 = vor.u32 %v1393_v63, %v1392_v28  ;;  %vm1404_vm0 = vcmp.lt.s32.totalorder %v2912_v22, 4  ;;  %v885_v1 = vmul.f32 -0.00019511016, %v2860_v49 }
 0x11e   :  { %v2941_v60 = vsel %vm2883_vm11, %v3366_v23, %v1027_v7  ;;  %v1400_v19 = vor.u32 %v1399_v18, %v1398_v38  ;;  %vm1403_vm2 = vcmp.lt.s32.totalorder %v2912_v22, 3  ;;  %v1177_v55 = vand.u32 2147483647, %v1176_v33 }
 0x11f   :  { %v1313_v43 = vadd.s32 536870912, %v1312_v9  ;;  %vm1402_vm3 = vcmp.lt.s32.totalorder %v2912_v22, 2  ;;  %v1409_v27 = vsel %vm1401_vm12, %v2926_v56, %v2928_v51  ;;  %v1179_v16 = vcvt.s32.f32 %v1172_v21 }
 0x120   :  { %v1410_v17 = vsel %vm1404_vm0, %v1397_v62, 920167782  ;;  %v1414_v35 = vsel %vm1404_vm0, %v1400_v19, 1326507024  ;;  %v2953_v32 = vshll.u32 %v1377_v24, 8  ;;  %v1413_v20 = vsel %vm1401_vm12, %v2928_v51, %v2934_v2 }
 0x121   :  { %v878_v10 = vmul.f32 -0.001358992, %v2860_v49  ;;  %v2956_v61 = vshrl.u32 %v1313_v43, 30  ;;  %v1411_v4 = vsel %vm1403_vm2, %v2934_v2, %v1410_v17  ;;  %v876_v40 = vsel %vm2772_vm1, 0, %v2856_v54 }
 0x122   :  { %v886_v59 = vadd.f32 0.008332121, %v885_v1  ;;  %v1412_v24 = vsel %vm1402_vm3, %v1409_v27, %v1411_v4  ;;  %v1415_v37 = vsel %vm1403_vm2, %v1397_v62, %v1414_v35  ;;  %v2973_v11 = vmul.f32 %v735_v13, %v2651_v26 }
 0x123   :  { %v2978_v28 = vmul.f32 %v2941_v60, %v2941_v60  ;;  %v1315_v63 = vshll.u32 %v2956_v61, 30  ;;  %v1180_v36 = vmul.f32 %v1179_v16, %v1177_v55  ;;  %v1416_v54 = vsel %vm1402_vm3, %v1413_v20, %v1415_v37 }
 0x124   :  { %v1418_v7 = vand.u32 65535, %v2953_v32  ;;  %v1419_v52 = vshrl.u32 %v2953_v32, 16  ;;  %v879_v46 = vadd.f32 0.041655596, %v878_v10  ;;  %v2985_v38 = vadd.s32 3, %v876_v40 }
 0x125   :  { %v1316_v26 = vsub.s32 %v1312_v9, %v1315_v63  ;;  %v1443_v33 = vshrl.u32 %v1412_v24, 16  ;;  %v887_v18 = vmul.f32 %v886_v59, %v2860_v49  ;;  %vm1061_vm1 = vcmp.lt.s32.totalorder %v2026_v5, 0 }
 0x126   :  { %v1420_v21 = vand.u32 65535, %v1416_v54  ;;  %v1421_v14 = vshrl.u32 %v1416_v54, 16  ;;  %v1040_v62 = vmul.f32 -0.00019511016, %v2978_v28  ;;  %v3370_v13 = vand.u32 2147483647, %v2026_v5 }
 0x127   :  { %vm1317_vm5 = vcmp.lt.s32.totalorder %v1316_v26, 0  ;;  %v1318_v19 = vsub.s32 0, %v1316_v26  ;;  %v1181_v55 = vxor.u32 2147483648, %v1180_v36  ;;  %v2999_v16 = vmul.f32 %v879_v46, %v2860_v49 }
 0x128   :  { %vm2992_vm4 = vcmp.le.f32.partialorder %v3370_v13, 0.7853982  ;;  %v1422_v43 = vmul.u32 %v1420_v21, %v1418_v7  ;;  %v1423_v9 = vmul.u32 %v1421_v14, %v1418_v7  ;;  %v2996_v27 = vmul.u32 %v1420_v21, %v1419_v52 }
 0x129   :  { %v1319_v17 = vsel %vm1317_vm5, %v1318_v19, %v1316_v26  ;;  %v1442_v35 = vand.u32 65535, %v1412_v24  ;;  %v3001_v10 = vmul.u32 %v1443_v33, %v1418_v7  ;;  %v3003_v4 = vadd.f32 -0.16666654, %v887_v18 }
 0x12a   :  { %v1320_v20 = vclz %v1319_v17  ;;  %v1425_v40 = vmul.u32 %v1421_v14, %v1419_v52  ;;  %v1426_v59 = vshll.u32 %v1423_v9, 16  ;;  %v1028_v37 = vsub.s32 4, %v2606_v50 }
 0x12b   :  { %v1033_v63 = vmul.f32 -0.001358992, %v2978_v28  ;;  %v1041_v54 = vadd.f32 0.008332121, %v1040_v62  ;;  %v1428_v21 = vshll.u32 %v2996_v27, 16  ;;  %v1182_v46 = vsel %vm1061_vm1, %v1181_v55, %v1180_v36 }
 0x12c   :  { %v1710_v13 = vadd.s32 4294967294, %v1320_v20  ;;  %vm1430_vm6 = vc.u32 %v1422_v43, %v1426_v59  ;;  %v1432_v24 = vadd.s32 %v1426_v59, %v1422_v43  ;;  %v1444_v18 = vmul.u32 %v1442_v35, %v1418_v7 }
 0x12d   :  { %v1431_v19 = vsel %vm1430_vm6, 1, %v3347_v44  ;;  %v1446_v12 = vmul.u32 %v1442_v35, %v1419_v52  ;;  %v1448_v14 = vshll.u32 %v3001_v10, 16  ;;  %v1308_v17 = vadd.s32 %v2897_v34, %v2895_v6 }
 0x12e   :  { %vm1711_vm8 = vcmp.lt.s32.totalorder %v1710_v13, 0  ;;  %v1433_v41 = vadd.s32 %v1431_v19, %v1425_v40  ;;  %vm1434_vm7 = vc.u32 %v1432_v24, %v1428_v21  ;;  %v1427_v48 = vshrl.u32 %v1423_v9, 16 }
 0x12f   :  { %v1323_v62 = vsel %vm1711_vm8, 0, %v1710_v13  ;;  %v1435_v31 = vsel %vm1434_vm7, 1, %v3347_v44  ;;  %v1447_v36 = vmul.u32 %v1443_v33, %v1419_v52  ;;  %v1034_v15 = vadd.f32 0.041655596, %v1033_v63 }
 0x130   :  { %v1324_v55 = vsub.s32 32, %v1323_v62  ;;  %v1325_v20 = vshll.u32 %v1316_v26, %v1323_v62  ;;  %v1328_v43 = vsub.s32 4294967266, %v1323_v62  ;;  %v1437_v59 = vadd.s32 %v1435_v31, %v1433_v41 }
 0x131   :  { %v1385_v7 = vshrl.u32 %v3346_v29, %v2900_v58  ;;  %v1450_v35 = vshll.u32 %v1446_v12, 16  ;;  %vm1452_vm9 = vc.u32 %v1444_v18, %v1448_v14  ;;  %v3020_v6 = vsel %vm2992_vm4, %v2026_v5, %v1182_v46 }
 0x132   :  { %v1326_v34 = vshrl.u32 %v1308_v17, %v1324_v55  ;;  %v1329_v9 = vadd.s32 127, %v1328_v43  ;;  %v1453_v40 = vsel %vm1452_vm9, 1, %v3347_v44  ;;  %vm741_vm13 = vcmp.eq.s32.totalorder %v2841_v0, 0 }
 0x133   :  { %vm744_vm15 = vcmp.eq.s32.totalorder %v2841_v0, 2  ;;  %v1042_v31 = vmul.f32 %v1041_v54, %v2978_v28  ;;  %v1406_v29 = vsel %vm1404_vm0, %v2934_v2, 2102212464  ;;  %v1454_v58 = vadd.s32 %v1448_v14, %v1444_v18 }
 0x134   :  { %v1455_v41 = vadd.s32 %v1453_v40, %v1447_v36  ;;  %v1327_v52 = vor.u32 %v1326_v34, %v1325_v20  ;;  %v1330_v26 = vshll.u32 %v1329_v9, 23  ;;  %v1429_v33 = vshrl.u32 %v2996_v27, 16 }
 0x135   :  { %v1438_v63 = vadd.s32 %v1437_v59, %v1427_v48  ;;  %v3032_v21 = vmul.f32 %v3020_v6, %v3020_v6  ;;  %v1405_v46 = vsel %vm1401_vm12, %v1385_v7, %v2926_v56  ;;  %v1449_v54 = vshrl.u32 %v3001_v10, 16 }
 0x136   :  { %vm1456_vm5 = vc.u32 %v1454_v58, %v1450_v35  ;;  %v1331_v13 = vor.u32 4788187, %v1330_v26  ;;  %v1334_v2 = vcvt.s32.f32 %v1327_v52  ;;  %v1407_v24 = vsel %vm1403_vm2, %v2928_v51, %v1406_v29 }
 0x137   :  { %v1457_v27 = vsel %vm1456_vm5, 1, %v3347_v44  ;;  %v742_v48 = vxor.u32 2147483648, %v2973_v11  ;;  %v1029_v19 = vsel %vm906_vm10, %v1028_v37, %v2606_v50  ;;  %v1451_v18 = vshrl.u32 %v1446_v12, 16 }
 0x138   :  { %v1459_v14 = vadd.s32 %v1457_v27, %v1455_v41  ;;  %v1035_v56 = vmul.f32 %v1034_v15, %v2978_v28  ;;  %v1332_v10 = vand.u32 2147483647, %v1331_v13  ;;  %v3047_v17 = vadd.s32 %v1438_v63, %v1429_v33 }
 0x139   :  { %v3049_v62 = vadd.s32 %v1454_v58, %v1450_v35  ;;  %v1043_v36 = vadd.f32 -0.16666654, %v1042_v31  ;;  %v1195_v51 = vmul.f32 -0.00019511016, %v3032_v21  ;;  %v1408_v55 = vsel %vm1402_vm3, %v1405_v46, %v1407_v24 }
 0x13a   :  { %v1460_v20 = vadd.s32 %v1459_v14, %v1449_v54  ;;  %v881_v43 = vadd.f32 -0.4999988, %v2999_v16  ;;  %v889_v50 = vmul.f32 %v3003_v4, %v2860_v49  ;;  %v3058_v12 = vand.u32 3, %v2985_v38 }
 0x13b   :  { %v1335_v15 = vmul.f32 %v1334_v2, %v1332_v10  ;;  %v1031_v37 = vsel %vm2883_vm11, 0, %v1029_v19  ;;  %v3373_v59 = vand.u32 2147483647, %v2030_v45  ;;  %vm1216_vm12 = vcmp.lt.s32.totalorder %v2030_v45, 0 }
 0x13c   :  { %v1461_v22 = vadd.s32 %v1460_v20, %v1451_v18  ;;  %v1036_v16 = vadd.f32 -0.4999988, %v1035_v56  ;;  %v1462_v4 = vmul.u32 %v2953_v32, %v1408_v55  ;;  %vm1464_vm0 = vc.u32 %v3047_v17, %v3049_v62 }
 0x13d   :  { %vm3064_vm10 = vcmp.le.f32.partialorder %v3373_v59, 0.7853982  ;;  %v1336_v35 = vxor.u32 2147483648, %v1335_v15  ;;  %v1044_v38 = vmul.f32 %v1043_v36, %v2978_v28  ;;  %v1188_v53 = vmul.f32 -0.001358992, %v3032_v21 }
 0x13e   :  { %v1196_v34 = vadd.f32 0.008332121, %v1195_v51  ;;  %v1465_v9 = vadd.s32 1, %v1461_v22  ;;  %v3077_v40 = vsel %vm741_vm13, %v2851_v3, %v742_v48  ;;  %v3376_v31 = vxor.u32 2147483648, %v2851_v3 }
 0x13f   :  { %v882_v29 = vmul.f32 %v881_v43, %v2860_v49  ;;  %v1337_v58 = vsel %vm1216_vm12, %v1336_v35, %v1335_v15  ;;  %v890_v41 = vadd.f32 1.0, %v889_v50  ;;  %v1048_v52 = vadd.s32 3, %v1031_v37 }
 0x140   :  { %v3084_v32 = vsel %vm744_vm15, %v3376_v31, %v2973_v11  ;;  %v3092_v26 = vsel %vm3064_vm10, %v2030_v45, %v1337_v58  ;;  %v1466_v33 = vsel %vm1464_vm0, %v1465_v9, %v1461_v22  ;;  %vm896_vm11 = vcmp.eq.s32.totalorder %v3058_v12, 0 }
 0x141   :  { %v1183_v3 = vsub.s32 4, %v2755_v30  ;;  %v1342_v11 = vmul.f32 %v3092_v26, %v3092_v26  ;;  %v1467_v63 = vadd.s32 %v1466_v33, %v1462_v4  ;;  %v1037_v49 = vmul.f32 %v1036_v16, %v2978_v28 }
 0x142   :  { %v1045_v46 = vadd.f32 1.0, %v1044_v38  ;;  %v1189_v54 = vadd.f32 0.041655596, %v1188_v53  ;;  %v1197_v13 = vmul.f32 %v1196_v34, %v3032_v21  ;;  %v883_v2 = vadd.f32 1.0, %v882_v29 }
 0x143   :  { %v1343_v24 = vmul.f32 -0.001358992, %v1342_v11  ;;  %v1350_v27 = vmul.f32 -0.00019511016, %v1342_v11  ;;  %v1468_v48 = vadd.s32 536870912, %v1467_v63  ;;  %vm740_vm2 = vcmp.lt.s32.totalorder %v2841_v0, 2 }
 0x144   :  { %v891_v19 = vmul.f32 %v890_v41, %v2846_v42  ;;  %vm899_vm3 = vcmp.eq.s32.totalorder %v3058_v12, 2  ;;  %v1049_v18 = vand.u32 3, %v1048_v52  ;;  %v1338_v14 = vsub.s32 4, %v2956_v61 }
 0x145   :  { %v1184_v28 = vsel %vm1061_vm1, %v1183_v3, %v2755_v30  ;;  %v1344_v56 = vadd.f32 0.041655596, %v1343_v24  ;;  %v1351_v10 = vadd.f32 0.008332121, %v1350_v27  ;;  %v3107_v36 = vshrl.u32 %v1468_v48, 30 }
 0x146   :  { %v1038_v51 = vadd.f32 1.0, %v1037_v49  ;;  %v1046_v55 = vmul.f32 %v1045_v46, %v2941_v60  ;;  %v1190_v20 = vmul.f32 %v1189_v54, %v3032_v21  ;;  %v1198_v43 = vadd.f32 -0.16666654, %v1197_v13 }
 0x147   :  { %v900_v42 = vxor.u32 2147483648, %v883_v2  ;;  %v1345_v50 = vmul.f32 %v1344_v56, %v1342_v11  ;;  %v1352_v15 = vmul.f32 %v1351_v10, %v1342_v11  ;;  %v1470_v37 = vshll.u32 %v3107_v36, 30 }
 0x148   :  { %v897_v59 = vxor.u32 2147483648, %v891_v19  ;;  %vm1051_vm6 = vcmp.eq.s32.totalorder %v1049_v18, 0  ;;  %vm1054_vm8 = vcmp.eq.s32.totalorder %v1049_v18, 2  ;;  %v1339_v30 = vsel %vm1216_vm12, %v1338_v14, %v2956_v61 }
 0x149   :  { %v1186_v22 = vsel %vm2992_vm4, 0, %v1184_v28  ;;  %v1346_v16 = vadd.f32 -0.4999988, %v1345_v50  ;;  %v1353_v60 = vadd.f32 -0.16666654, %v1352_v15  ;;  %v1471_v35 = vsub.s32 %v1467_v63, %v1470_v37 }
 0x14a   :  { %v1052_v4 = vxor.u32 2147483648, %v1046_v55  ;;  %v1055_v38 = vxor.u32 2147483648, %v1038_v51  ;;  %v1191_v53 = vadd.f32 -0.4999988, %v1190_v20  ;;  %v1199_v34 = vmul.f32 %v1198_v43, %v3032_v21 }
 0x14b   :  { %v1341_v9 = vsel %vm3064_vm10, 0, %v1339_v30  ;;  %v1354_v31 = vmul.f32 %v1353_v60, %v1342_v11  ;;  %vm1472_vm1 = vcmp.lt.s32.totalorder %v1471_v35, 0  ;;  %v1473_v29 = vsub.s32 0, %v1471_v35 }
 0x14c   :  { %vm895_vm7 = vcmp.lt.s32.totalorder %v3058_v12, 2  ;;  %v898_v61 = vsel %vm896_vm11, %v883_v2, %v897_v59  ;;  %v901_v1 = vsel %vm899_vm3, %v900_v42, %v891_v19  ;;  %vm1050_vm4 = vcmp.lt.s32.totalorder %v1049_v18, 2 }
 0x14d   :  { %v1203_v58 = vadd.s32 3, %v1186_v22  ;;  %v1347_v41 = vmul.f32 %v1346_v16, %v1342_v11  ;;  %v1355_v52 = vadd.f32 1.0, %v1354_v31  ;;  %v1474_v33 = vsel %vm1472_vm1, %v1473_v29, %v1471_v35 }
 0x14e   :  { %v1053_v3 = vsel %vm1051_vm6, %v1038_v51, %v1052_v4  ;;  %v1056_v7 = vsel %vm1054_vm8, %v1055_v38, %v1046_v55  ;;  %v1358_v63 = vadd.s32 3, %v1341_v9  ;;  %v1475_v49 = vclz %v1474_v33  ;;  %v3377_v33 = vld [vmem:[#allocation27_spill] sm:$0xff] }
 0x14f   :  { %vm737_vm9 = vweird.f32 %v1965_v8  ;;  %v747_v46 = vsel %vm740_vm2, %v3077_v40, %v3084_v32  ;;  %v1192_v54 = vmul.f32 %v1191_v53, %v3032_v21  ;;  %v1200_v13 = vadd.f32 1.0, %v1199_v34 }
 0x150   :  { %vm892_vm13 = vweird.f32 %v2020_v25  ;;  %v902_v11 = vsel %vm895_vm7, %v898_v61, %v901_v1  ;;  %vm1047_vm15 = vweird.f32 %v3366_v23  ;;  %v1713_v2 = vadd.s32 4294967294, %v1475_v49 }
 0x151   :  { %v1057_v24 = vsel %vm1050_vm4, %v1053_v3, %v1056_v7  ;;  %v3138_v27 = vand.u32 3, %v1203_v58  ;;  %v1348_v8 = vadd.f32 1.0, %v1347_v41  ;;  %v1356_v48 = vmul.f32 %v1355_v52, %v3092_v26  ;;  %v1734_v52 = vld [vmem:[#allocation4] sm:$0x7f] }
 0x152   :  { %v748_v0 = vsel %vm737_vm9, nan, %v747_v46  ;;  %v1359_v40 = vand.u32 3, %v1358_v63  ;;  %v1463_v21 = vadd.s32 %v3049_v62, %v3047_v17  ;;  %vm1714_vm5 = vcmp.lt.s32.totalorder %v1713_v2, 0  ;;  %v3379_v7 = vld [vmem:[#allocation14_spill] sm:$0xff]  ;;  %v3404_v46 = vld [vmem:[#allocation16_spill] sm:$0xff] }
 0x153   :  { %v903_v25 = vsel %vm892_vm13, nan, %v902_v11  ;;  %v1193_v32 = vadd.f32 1.0, %v1192_v54  ;;  %v1201_v12 = vmul.f32 %v1200_v13, %v3020_v6  ;;  %v1478_v19 = vsel %vm1714_vm5, 0, %v1713_v2  ;;  %v3384_v54 = vld [vmem:[#allocation28_spill] sm:$0xff]  ;;  %v3385_v11 = vld [vmem:[#allocation29_spill] sm:$0xff] }
 0x154   :  { %v1058_v23 = vsel %vm1047_vm15, nan, %v1057_v24  ;;  %v1479_v14 = vsub.s32 32, %v1478_v19  ;;  %v1480_v18 = vshll.u32 %v1471_v35, %v1478_v19  ;;  %v1483_v28 = vsub.s32 4294967266, %v1478_v19 }
 0x155   :  { %vm1206_vm10 = vcmp.eq.s32.totalorder %v3138_v27, 0  ;;  %vm1209_vm12 = vcmp.eq.s32.totalorder %v3138_v27, 2  ;;  %v1362_v26 = vxor.u32 2147483648, %v1356_v48  ;;  %v1365_v56 = vxor.u32 2147483648, %v1348_v8 }
 0x156   :  { %vm1205_vm0 = vcmp.lt.s32.totalorder %v3138_v27, 2  ;;  %vm1361_vm11 = vcmp.eq.s32.totalorder %v1359_v40, 0  ;;  %vm1364_vm2 = vcmp.eq.s32.totalorder %v1359_v40, 2  ;;  %v1481_v17 = vshrl.u32 %v1463_v21, %v1479_v14  ;;  %v3387_v21 = vld [vmem:[#allocation20_spill] sm:$0xff] }
 0x157   :  { %v1484_v62 = vadd.s32 127, %v1483_v28  ;;  %v1207_v10 = vxor.u32 2147483648, %v1201_v12  ;;  %v1210_v51 = vxor.u32 2147483648, %v1193_v32  ;;  %vm1360_vm3 = vcmp.lt.s32.totalorder %v1359_v40, 2  ;;  %v3389_v28 = vld [vmem:[#allocation22_spill] sm:$0xff] }
 0x158   :  { %v1493_v6 = vsub.s32 4, %v3107_v36  ;;  %v1482_v55 = vor.u32 %v1481_v17, %v1480_v18  ;;  %v1524_v43 = vadd.f32 1.0, %v2836_v39  ;;  %v1525_v42 = vadd.f32 1.0, %v748_v0  ;;  %v3386_v0 = vld [vmem:[#allocation30_spill] sm:$0xff] }
 0x159   :  { %v1485_v20 = vshll.u32 %v1484_v62, 23  ;;  %v1363_v50 = vsel %vm1361_vm11, %v1348_v8, %v1362_v26  ;;  %v1366_v15 = vsel %vm1364_vm2, %v1365_v56, %v1356_v48  ;;  %v1526_v37 = vadd.f32 1.0, %v903_v25  ;;  %v3390_v56 = vld [vmem:[#allocation23_spill] sm:$0xff] }
 0x15a   :  { %v1527_v59 = vadd.f32 1.0, %v1058_v23  ;;  %v1489_v22 = vcvt.s32.f32 %v1482_v55  ;;  %v1531_v16 = vmul.f32 0.5, %v1524_v43  ;;  %v1532_v60 = vmul.f32 0.5, %v1525_v42  ;;  %v3388_v23 = vld [vmem:[#allocation21_spill] sm:$0xff] }
 0x15b   :  { %v1486_v30 = vor.u32 4788187, %v1485_v20  ;;  %v1211_v35 = vsel %vm1209_vm12, %v1210_v51, %v1201_v12  ;;  %vm1371_vm6 = vcmp.lt.s32.totalorder %v2032_v47, 0  ;;  %v1533_v4 = vmul.f32 0.5, %v1526_v37 }
 0x15c   :  { %v1534_v38 = vmul.f32 0.5, %v1527_v59  ;;  %v1208_v53 = vsel %vm1206_vm10, %v1193_v32, %v1207_v10  ;;  %v1538_v34 = vadd.f32 0.25, %v1531_v16  ;;  %v1539_v9 = vadd.f32 0.25, %v1532_v60 }
 0x15d   :  { %v1487_v39 = vand.u32 2147483647, %v1486_v30  ;;  %vm1357_vm8 = vweird.f32 %v2030_v45  ;;  %v1367_v31 = vsel %vm1360_vm3, %v1363_v50, %v1366_v15  ;;  %v1540_v29 = vadd.f32 0.25, %v1533_v4 }
 0x15e   :  { %v1541_v61 = vadd.f32 0.25, %v1534_v38  ;;  %v1494_v58 = vsel %vm1371_vm6, %v1493_v6, %v3107_v36  ;;  %v1545_v41 = vmul.f32 %v1538_v34, %v2728_v57  ;;  %vm1559_vm1 = vcmp.lt.s32.totalorder %v1734_v52, 100  ;;  %v3395_v38 = vld [vmem:[#allocation19_spill] sm:$0xff] }
 0x15f   :  { %v1490_v1 = vmul.f32 %v1489_v22, %v1487_v39  ;;  %v3378_v3 = vand.u32 1, %v3377_v33  ;;  %v3380_v63 = vperm.slane %v3379_v7, 5  ;;  %vm1202_vm7 = vweird.f32 %v2026_v5  ;;  %v3396_v39 = vld [vmem:[#allocation17_spill] sm:$0xff] }
 0x160   :  { %v3381_v45 = vand.u32 2147483647, %v2032_v47  ;;  %v1546_v36 = vmul.f32 %v1539_v9, %v3384_v54  ;;  %v1368_v13 = vsel %vm1357_vm8, nan, %v1367_v31  ;;  %v1547_v2 = vmul.f32 %v1540_v29, %v3385_v11  ;;  %v3399_v31 = vld [vmem:[#allocation24_spill] sm:$0xff] }
 0x161   :  { %v3164_v49 = vxor.u32 %v3380_v63, %v3378_v3  ;;  %v1491_v57 = vxor.u32 2147483648, %v1490_v1  ;;  %v3176_v24 = vsel %vm1559_vm1, 1, %v3347_v44  ;;  %v1212_v8 = vsel %vm1205_vm0, %v1208_v53, %v1211_v35  ;;  %v3393_v35 = vld [vmem:[#allocation15_spill] sm:$0xff] }
 0x162   :  { %vm3169_vm4 = vcmp.le.f32.partialorder %v3381_v45, 0.7853982  ;;  %v1548_v40 = vmul.f32 %v1541_v61, %v3386_v0  ;;  %vm1552_vm9 = vcmp.lt.f32.partialorder %v3387_v21, %v1545_v41  ;;  %v1561_v32 = vperm.slane %v3176_v24, 0 }
 0x163   :  { %v1496_v48 = vsel %vm3169_vm4, 0, %v1494_v58  ;;  %v1492_v25 = vsel %vm1371_vm6, %v1491_v57, %v1490_v1  ;;  %v1562_v12 = vperm.slane %v3176_v24, 1  ;;  %v1563_v44 = vperm.slane %v3176_v24, 2  ;;  %v3401_v1 = vld [vmem:[#allocation26_spill] sm:$0xff] }
 0x164   :  { %v3192_v27 = vsel %vm3169_vm4, %v2032_v47, %v1492_v25  ;;  %v1529_v19 = vadd.f32 1.0, %v1368_v13  ;;  %vm1553_vm13 = vcmp.lt.f32.partialorder %v3388_v23, %v1546_v36  ;;  %v1564_v14 = vperm.slane %v3176_v24, 3  ;;  %v3406_v13 = vld [vmem:[#allocation18_spill] sm:$0xff] }
 0x165   :  { %v1497_v18 = vmul.f32 %v3192_v27, %v3192_v27  ;;  %vm1554_vm15 = vcmp.lt.f32.partialorder %v3389_v28, %v1547_v2  ;;  %vm1568_vm5 = vcmp.eq.s32.totalorder %v1561_v32, 1  ;;  %vm1569_vm10 = vcmp.eq.s32.totalorder %v1562_v12, 1 }
 0x166   :  { %v363_v26 = vcvt.s32.f32 %v3164_v49  ;;  %vm1555_vm12 = vcmp.lt.f32.partialorder %v3390_v56, %v1548_v40  ;;  %vm1570_vm0 = vcmp.eq.s32.totalorder %v1563_v44, 1  ;;  %vm1571_vm11 = vcmp.eq.s32.totalorder %v1564_v14, 1  ;;  %vm3203_vm2 = vmand %vm1552_vm9, %vm1568_vm5 }
 0x167   :  { %v1213_v62 = vsel %vm1202_vm7, nan, %v1212_v8  ;;  %v1498_v10 = vmul.f32 -0.001358992, %v1497_v18  ;;  %v1505_v51 = vmul.f32 -0.00019511016, %v1497_v18  ;;  %vm1576_vm3 = vmand %vm1553_vm13, %vm1569_vm10  ;;  %v1513_v6 = vadd.s32 3, %v1496_v48 }
 0x168   :  { %v1536_v55 = vmul.f32 0.5, %v1529_v19  ;;  %vm1577_vm6 = vmand %vm1554_vm15, %vm1570_vm0  ;;  %v1822_v20 = vmov 0.0   ;;  %vm1608_vm8 = vcmask 1041408   ;;  %vm1610_vm7 = vcmask 1045508  }
 0x169   :  { %v1716_v43 = vsel %vm1576_vm3, 1.0, %v1822_v20  ;;  %v1499_v42 = vadd.f32 0.041655596, %v1498_v10  ;;  %v1506_v50 = vadd.f32 0.008332121, %v1505_v51  ;;  %vm1578_vm1 = vmand %vm1555_vm12, %vm1571_vm11  ;;  %v1717_v15 = vsel %vm1577_vm6, 1.0, %v1822_v20 }
 0x16a   :  { %v1603_v37 = vrot.slane %v1716_v43, 6  ;;  %v1715_v5 = vsel %vm3203_vm2, 1.0, %v1822_v20  ;;  %v1718_v59 = vsel %vm1578_vm1, 1.0, %v1822_v20  ;;  %v1604_v30 = vrot.slane %v1717_v15, 4 }
 0x16b   :  { %v1500_v22 = vmul.f32 %v1499_v42, %v1497_v18  ;;  %v1507_v16 = vmul.f32 %v1506_v50, %v1497_v18  ;;  %v1605_v60 = vrot.slane %v1718_v59, 2  ;;  %vm1612_vm4 = vcmask 1043456  }
 0x16c   :  { %v3394_v4 = vmul.u32 3266489909, %v3393_v35  ;;  %v3397_v34 = vperm.slane %v3396_v39, 6  ;;  %v3400_v29 = vsel %vm2365_vm14, %v3399_v31, 0  ;;  %v3402_v58 = vand.u32 1, %v3401_v1 }
 0x16d   :  { %v3403_v41 = vperm.slane %v3379_v7, 4  ;;  %v1609_v33 = vsel %vm1608_vm8, %v1715_v5, %v1603_v37  ;;  %v1501_v3 = vadd.f32 -0.4999988, %v1500_v22  ;;  %v1508_v63 = vadd.f32 -0.16666654, %v1507_v16 }
 0x16e   :  { %v262_v53 = vxor.u32 %v3395_v38, %v3394_v4  ;;  %v336_v61 = vshra.s32 %v3400_v29, %v3397_v34  ;;  %v1528_v49 = vadd.f32 1.0, %v1213_v62  ;;  %v1611_v45 = vsel %vm1610_vm7, %v1604_v30, %v1605_v60 }
 0x16f   :  { %v355_v52 = vxor.u32 %v3403_v41, %v3402_v58  ;;  %v3405_v54 = vmul.u32 3266489909, %v3404_v46  ;;  %v3407_v57 = vshrl.u32 %v3406_v13, 8  ;;  %v1514_v2 = vand.u32 3, %v1513_v6 }
 0x170   :  { %v1613_v8 = vsel %vm1612_vm4, %v1609_v33, %v1611_v45  ;;  %v370_v48 = vmul.f32 0.1, %v363_v26  ;;  %v1502_v0 = vmul.f32 %v1501_v3, %v1497_v18  ;;  %v1509_v40 = vmul.f32 %v1508_v63, %v1497_v18 }
 0x171   :  { %v1686_v36 = vshrl.u32 %v3405_v54, 16  ;;  %v284_v11 = vcvt.s32.f32 %v3407_v57  ;;  %v1543_v21 = vadd.f32 0.25, %v1536_v55  ;;  %1618 = vst [vmem:[#allocation9] sm:$0xff] %v1613_v8  ;;  %v1691_v25 = vshrl.u32 %v262_v53, 8 }
 0x172   :  { %v343_v32 = vand.u32 1, %v336_v61  ;;  %v350_v12 = vperm.slane %v3379_v7, 6  ;;  %v362_v44 = vcvt.s32.f32 %v355_v52  ;;  %v1503_v19 = vadd.f32 1.0, %v1502_v0 }
 0x173   :  { %v1510_v23 = vadd.f32 1.0, %v1509_v40  ;;  %v1535_v14 = vmul.f32 0.5, %v1528_v49  ;;  %v3408_v28 = vmov %v3405_v54  ;;  %v291_v17 = vmul.f32 5.9604645e-08, %v284_v11 }
 0x174   :  { %v264_v56 = vxor.u32 %v1686_v36, %v3408_v28  ;;  %vm1519_vm14 = vcmp.eq.s32.totalorder %v1514_v2, 2  ;;  %v1520_v26 = vxor.u32 2147483648, %v1503_v19  ;;  %v1550_v10 = vmul.f32 %v1543_v21, %v370_v48 }
 0x175   :  { %v1511_v62 = vmul.f32 %v1510_v23, %v3192_v27  ;;  %v1566_v18 = vperm.slane %v3176_v24, 5  ;;  %v283_v51 = vcvt.s32.f32 %v1691_v25  ;;  %v357_v6 = vxor.u32 %v350_v12, %v343_v32 }
 0x176   :  { %v369_v55 = vmul.f32 0.1, %v362_v44  ;;  %vm1516_vm9 = vcmp.eq.s32.totalorder %v1514_v2, 0  ;;  %vm1515_vm13 = vcmp.lt.s32.totalorder %v1514_v2, 2  ;;  %v1542_v42 = vadd.f32 0.25, %v1535_v14 }
 0x177   :  { %v1517_v7 = vxor.u32 2147483648, %v1511_v62  ;;  %v1521_v43 = vsel %vm1519_vm14, %v1520_v26, %v1511_v62  ;;  %v1693_v50 = vshrl.u32 %v264_v56, 8  ;;  %vm1512_vm15 = vweird.f32 %v2032_v47 }
 0x178   :  { %vm1557_vm5 = vcmp.lt.f32.partialorder %v291_v17, %v1550_v10  ;;  %vm1573_vm10 = vcmp.eq.s32.totalorder %v1566_v18, 1  ;;  %v364_v37 = vcvt.s32.f32 %v357_v6  ;;  %v290_v5 = vmul.f32 5.9604645e-08, %v283_v51 }
 0x179   :  { %v1518_v15 = vsel %vm1516_vm9, %v1503_v19, %v1517_v7  ;;  %v1549_v30 = vmul.f32 %v1542_v42, %v369_v55  ;;  %v1565_v22 = vperm.slane %v3176_v24, 4  ;;  %v285_v16 = vcvt.s32.f32 %v1693_v50  ;;  %vm1580_vm12 = vmand %vm1557_vm5, %vm1573_vm10 }
 0x17a   :  { %v1522_v27 = vsel %vm1515_vm13, %v1518_v15, %v1521_v43  ;;  %v371_v35 = vmul.f32 0.1, %v364_v37  ;;  %v1567_v38 = vperm.slane %v3176_v24, 6  ;;  %v1720_v47 = vsel %vm1580_vm12, 1.0, %v1822_v20 }
 0x17b   :  { %v1523_v59 = vsel %vm1512_vm15, nan, %v1522_v27  ;;  %vm1556_vm0 = vcmp.lt.f32.partialorder %v290_v5, %v1549_v30  ;;  %vm1572_vm11 = vcmp.eq.s32.totalorder %v1565_v22, 1  ;;  %v292_v53 = vmul.f32 5.9604645e-08, %v285_v16 }
 0x17c   :  { %v1530_v60 = vadd.f32 1.0, %v1523_v59  ;;  %vm1619_vm2 = vcmask 1043458   ;;  %vm1574_vm3 = vcmp.eq.s32.totalorder %v1567_v38, 1  ;;  %vm1579_vm6 = vmand %vm1556_vm0, %vm1572_vm11  ;;  %v1606_v9 = vrot.slane %v1720_v47, 6 }
 0x17d   :  { %vm1620_vm7 = vmor %vm1619_vm2, %vm1608_vm8  ;;  %vm1621_vm14 = vcmask 914436   ;;  %v1719_v31 = vsel %vm1579_vm6, 1.0, %v1822_v20 }
 0x17e   :  { %v1537_v4 = vmul.f32 0.5, %v1530_v60  ;;  %v1614_v29 = vsel %vm1608_vm8, %v1719_v31, %v1606_v9  ;;  %vm1622_vm13 = vmor %vm1621_vm14, %vm1620_vm7 }
 0x180   :  { %v1544_v39 = vadd.f32 0.25, %v1537_v4 }
 0x182   :  { %v1551_v34 = vmul.f32 %v1544_v39, %v371_v35 }
 0x184   :  { %vm1558_vm1 = vcmp.lt.f32.partialorder %v292_v53, %v1551_v34 }
 0x185   :  { %vm1581_vm9 = vmand %vm1558_vm1, %vm1574_vm3 }
 0x186   :  { %v1721_v24 = vsel %vm1581_vm9, 1.0, %v1822_v20 }
 0x187   :  { %v1607_v61 = vrot.slane %v1721_v24, 4 }
 0x189   :  { %v1615_v1 = vsel %vm1612_vm4, %v1614_v29, %v1607_v61 }
 0x18a   :  { %1623 = vst.msk [vmem:[#allocation9 + $0x8] sm:$0x3f] %vm1622_vm13, %v1615_v1 }
 0x18b   :  { %1634 = dma.vmem_to_hbm [thread:$0]  %s1630_s12, 224, %s1632_s15, [#allocation6]  }
 0x18c   :  { %1811 = dma.done.wait [#allocation6], 224  }
 0x18d   :  { %1812 = vsyncadd [#allocation6], 4294967072 }
 0x18e   :  { %1639 = vsyncpa [#allocation5], 1 }
 0x18f   :  { %1640 = vsyncpa [#allocation8], 1 }
 0x190   :  { %1641 = vsyncpa [#allocation6], 1 }

</bundles_post_ra>
